<compile_context>
chip_gen: v5e
topology: v5e:2x2
jax: 0.10.0
libtpu: 0.0.40
codegen_flags: <defaults>
</compile_context>

<pallas_src>
import functools

import jax
import jax.numpy as jnp
import numpy as np
from jax.experimental import pallas as pl
from jax.experimental.pallas import tpu as pltpu


def _pool_conv_kernel(x_ref, w_ref, z_ref, stats_ref, pbuf, imcol, *, cin, hp, wp):
    """Per grid step (B images): 2x2 max-pool -> padded 3x3 conv via one im2col matmul
    per image (channel-major result) -> partial BatchNorm statistics.

    x_ref    : (B, Cin, Hp, 2, Wp, 2) f32   NCHW input with the 2x2 pool pairs pre-split
    w_ref    : (Cout, 9*Cin)          f32   conv weight, columns ordered (ky, kx, ci)
    z_ref    : (B, Cout, M)           bf16  pre-BN conv output, channel-major (NCHW-flat)
    stats_ref: (1, Cout, 2)           f32   per-step [sum, sumsq] per channel
    pbuf     : (B, Cin, Hp+2, Wp+2)   f32   VMEM scratch: zero-bordered pooled tile
    imcol    : (B, 9*Cin, M)          f32   VMEM scratch: K-major im2col buffer
    """
    B = x_ref.shape[0]
    M = hp * wp

    xw = x_ref[...]                                              # (B, Cin, Hp, 2, Wp, 2)
    # MaxPool2d(2): max over the row pair, then over the column pair.
    rmax = jnp.maximum(xw[:, :, :, 0, :, :], xw[:, :, :, 1, :, :])   # (B, Cin, Hp, Wp, 2)
    pooled = jnp.maximum(rmax[..., 0], rmax[..., 1])             # (B, Cin, Hp, Wp)

    # Conv2d(padding=1) border: zero only the 1-pixel frame (interior is overwritten
    # below every step).  Re-done each step so the kernel is correct even when the
    # "parallel" grid axis is sharded across TensorCores (no step-0-only init).
    zrow = jnp.zeros((B, cin, 1, wp + 2), jnp.float32)
    zcol = jnp.zeros((B, cin, hp + 2, 1), jnp.float32)
    pbuf[:, :, 0:1, :] = zrow
    pbuf[:, :, hp + 1:hp + 2, :] = zrow
    pbuf[:, :, :, 0:1] = zcol
    pbuf[:, :, :, wp + 1:wp + 2] = zcol
    pbuf[:, :, 1:hp + 1, 1:wp + 1] = pooled

    # K-major im2col: rows ordered (ky, kx, ci) to match w_ref's columns, columns are
    # the flattened spatial positions (lane-dense M).  One tap extraction per (ky, kx)
    # covers all channels at once (9 relayouts per step, not 9*Cin).
    for ky in range(3):
        for kx in range(3):
            k = ky * 3 + kx
            tap = pbuf[:, :, ky:ky + hp, kx:kx + wp]             # (B, Cin, Hp, Wp)
            imcol[:, k * cin:(k + 1) * cin, :] = tap.reshape(B, cin, M)

    # (Cout, 9*Cin) @ (9*Cin, M): channel-major result straight off the MXU -> no
    # transpose, z store lane-dense over M.  f32 operands / f32 accumulation.
    w = w_ref[...]
    cout = w.shape[0]
    s = jnp.zeros((cout, 1), jnp.float32)
    ss = jnp.zeros((cout, 1), jnp.float32)
    for b in range(B):                                           # B is small & static
        zb = jnp.dot(w, imcol[b], preferred_element_type=jnp.float32)   # (Cout, M) f32
        z_ref[b] = zb.astype(z_ref.dtype)
        s = s + jnp.sum(zb, axis=1, keepdims=True)
        ss = ss + jnp.sum(zb * zb, axis=1, keepdims=True)
    # NOTE: E[x^2]-E[x]^2 in f32 — fine for BN-scale activations (see review caveat).
    stats_ref[0] = jnp.concatenate([s, ss], axis=1)              # (Cout, 2)


def _bn_act_kernel(scale_ref, shift_ref, z_ref, o_ref):
    """Per grid step: streaming y = z*scale + shift, then LeakyReLU(0.2).

    scale/shift are the batch-wide BN scale/shift (gamma, beta, mean, var already
    folded in by the wrapper); z is the bf16 pre-BN conv output.
    """
    z = z_ref[...].astype(jnp.float32)                           # (B, Cout, M)
    y = z * scale_ref[...][None, :, :] + shift_ref[...][None, :, :]
    o_ref[...] = jnp.where(y > 0.0, y, 0.2 * y)                  # LeakyReLU(0.2)


def _pick_images_per_step(n, cin, cout, h, w):
    """Largest B dividing N that keeps >=2 grid steps (v7x megacore) and a per-step
    VMEM footprint of a few MiB (sized for v7x's 64 MiB/TC with double buffering)."""
    hp, wp = h // 2, w // 2
    m = hp * wp
    per_image = (cin * h * w * 4                      # input block
                 + cin * (hp + 2) * (wp + 2) * 4      # pbuf scratch
                 + 9 * cin * m * 4                    # im2col scratch
                 + cout * m * 2                       # z block (bf16)
                 + cout * m * 4)                      # pass-2 output block
    budget = 8 << 20
    best = 1
    for b in range(1, n + 1):
        if n % b:
            continue
        if n >= 2 and n // b < 2:
            continue
        if b * per_image > budget:
            continue
        best = b
    return best


def down_forward(x_nchw, w_hwio, gamma, beta, *, eps=1e-5, images_per_step=None):
    """Down(in_ch, out_ch) forward.  Input and output are NCHW (PyTorch convention)."""
    # TODO(synk): BatchNorm2d running_mean/running_var momentum update (training-side
    # module state) is not emitted; the forward output does not depend on it.
    N, Cin, H, W = x_nchw.shape
    assert H % 2 == 0 and W % 2 == 0, "MaxPool2d(2) path assumes even spatial dims"
    Hp, Wp = H // 2, W // 2
    Cout = w_hwio.shape[-1]
    M = Hp * Wp

    # Metadata-only reshape exposing the 2x2 pool pairs.  No NCHW->NHWC transpose, no
    # cast, no extra HBM copy of the input.
    xr = x_nchw.reshape(N, Cin, Hp, 2, Wp, 2)

    # (Cout, 9*Cin) weight, columns ordered (ky, kx, ci) to match the im2col rows.
    # Tiny one-time reorder of the ~kB weight (not the activation tensor).
    w2 = w_hwio.reshape(9 * Cin, Cout).T.astype(jnp.float32)

    if images_per_step is None:
        images_per_step = _pick_images_per_step(N, Cin, Cout, H, W)
    B = images_per_step
    assert N % B == 0
    G = N // B

    cparams = pltpu.CompilerParams(
        dimension_semantics=("parallel",),            # megacore-shardable grid (v7x)
        vmem_limit_bytes=32 * 1024 * 1024)            # explicit budget (64 MiB/TC on v7x)

    # Pass 1: pool + conv + partial BN stats, B images per grid step.
    kern1 = functools.partial(_pool_conv_kernel, cin=Cin, hp=Hp, wp=Wp)
    z, stats = pl.pallas_call(
        kern1,
        grid=(G,),
        in_specs=[
            pl.BlockSpec((B, Cin, Hp, 2, Wp, 2), lambda i: (i, 0, 0, 0, 0, 0)),
            pl.BlockSpec((Cout, 9 * Cin), lambda i: (0, 0)),
        ],
        out_specs=(
            pl.BlockSpec((B, Cout, M), lambda i: (i, 0, 0)),
            pl.BlockSpec((1, Cout, 2), lambda i: (i, 0, 0)),
        ),
        out_shape=(
            jax.ShapeDtypeStruct((N, Cout, M), jnp.bfloat16),   # bf16 z: halves HBM bytes
            jax.ShapeDtypeStruct((G, Cout, 2), jnp.float32),
        ),
        scratch_shapes=[
            pltpu.VMEM((B, Cin, Hp + 2, Wp + 2), jnp.float32),  # zero-bordered pooled tile
            pltpu.VMEM((B, 9 * Cin, M), jnp.float32),           # K-major im2col buffer
        ],
        compiler_params=cparams,
    )(xr, w2)

    # Finalize BN statistics ONCE (tiny plain-JAX op on (G, Cout, 2)); fold gamma/beta,
    # mean and rsqrt(var) into a single per-channel scale/shift for the streaming pass.
    count = float(N * M)
    tot = jnp.sum(stats, axis=0)                                 # (Cout, 2)
    mean = tot[:, 0:1] / count
    var = tot[:, 1:2] / count - mean * mean                      # biased variance
    scale = gamma.reshape(Cout, 1).astype(jnp.float32) * jax.lax.rsqrt(var + eps)
    shift = beta.reshape(Cout, 1).astype(jnp.float32) - mean * scale

    # Pass 2: pure streaming scale + shift + LeakyReLU over lane-dense (B, Cout, M) tiles.
    out_flat = pl.pallas_call(
        _bn_act_kernel,
        grid=(G,),
        in_specs=[
            pl.BlockSpec((Cout, 1), lambda i: (0, 0)),
            pl.BlockSpec((Cout, 1), lambda i: (0, 0)),
            pl.BlockSpec((B, Cout, M), lambda i: (i, 0, 0)),
        ],
        out_specs=pl.BlockSpec((B, Cout, M), lambda i: (i, 0, 0)),
        out_shape=jax.ShapeDtypeStruct((N, Cout, M), jnp.float32),
        compiler_params=cparams,
    )(scale, shift, z)

    # Channel-major already == NCHW; this reshape is free.
    return out_flat.reshape(N, Cout, Hp, Wp)


def down_reference(x_nchw, w_hwio, gamma, beta, *, eps=1e-5):
    """Pure-f32 JAX reference matching the PyTorch module semantics."""
    pooled = jax.lax.reduce_window(x_nchw, -jnp.inf, jax.lax.max,
                                   (1, 1, 2, 2), (1, 1, 2, 2), "VALID")
    conv = jax.lax.conv_general_dilated(
        pooled, w_hwio, window_strides=(1, 1), padding="SAME",
        dimension_numbers=("NCHW", "HWIO", "NCHW"))
    mean = jnp.mean(conv, axis=(0, 2, 3), keepdims=True)
    var = jnp.mean((conv - mean) ** 2, axis=(0, 2, 3), keepdims=True)
    y = (conv - mean) * jax.lax.rsqrt(var + eps)
    y = y * gamma.reshape(1, -1, 1, 1) + beta.reshape(1, -1, 1, 1)
    return jnp.where(y > 0, y, 0.2 * y)


if __name__ == "__main__":
    key = jax.random.PRNGKey(0)
    kx, kw = jax.random.split(key)

    N, Cin, H, W = 2, 4, 16, 16      # small NCHW input, even spatial dims
    Cout = 8

    x = jax.random.normal(kx, (N, Cin, H, W), dtype=jnp.float32)
    # Conv2d(Cin, Cout, 3, bias=False) weight stored as HWIO; BatchNorm2d affine params
    # at their __init__ defaults (gamma=1, beta=0).
    fan_in = Cin * 3 * 3
    w_hwio = jax.random.normal(kw, (3, 3, Cin, Cout), dtype=jnp.float32) * (2.0 / fan_in) ** 0.5
    gamma = jnp.ones((Cout,), jnp.float32)
    beta = jnp.zeros((Cout,), jnp.float32)

    out = jax.block_until_ready(down_forward(x, w_hwio, gamma, beta))
    ref = jax.block_until_ready(down_reference(x, w_hwio, gamma, beta))

    assert out.shape == (N, Cout, H // 2, W // 2)
    # Tolerance covers the documented bf16 storage of the pre-BN conv output and MXU
    # default matmul precision on real hardware.
    np.testing.assert_allclose(np.asarray(out), np.asarray(ref), rtol=2e-2, atol=2e-2)
    print("KERNEL_OK")
</pallas_src>

<mosaic_0001>
module attributes {stable_mosaic.version = 11 : i64} {
  func.func @_pool_conv_kernel(%arg0: i32, %arg1: memref<1x4x8x2x8x2xf32, #tpu.memory_space<vmem>>, %arg2: memref<8x36xf32, #tpu.memory_space<vmem>>, %arg3: memref<1x8x64xbf16, #tpu.memory_space<vmem>>, %arg4: memref<1x8x2xf32, #tpu.memory_space<vmem>>, %arg5: memref<1x4x10x10xf32, #tpu.memory_space<vmem>>, %arg6: memref<1x36x64xf32, #tpu.memory_space<vmem>>) attributes {dimension_semantics = [#tpu.dimension_semantics<parallel>], iteration_bounds = array<i64: 2>, scalar_prefetch = 0 : i64, scratch_operands = 2 : i64, tpu.core_type = #tpu.core_type<tc>, window_params = [{transform_indices = @transform_0, window_bounds = array<i64: 1, 4, 8, 2, 8, 2>}, {pipeline_mode = #tpu.pipeline_mode<synchronous>, transform_indices = @transform_1, window_bounds = array<i64: 8, 36>}, {transform_indices = @transform_2, window_bounds = array<i64: 1, 8, 64>}, {transform_indices = @transform_3, window_bounds = array<i64: 1, 8, 2>}]} {
    %c0 = arith.constant 0 : index
    %c0_0 = arith.constant 0 : index
    %c0_1 = arith.constant 0 : index
    %c0_2 = arith.constant 0 : index
    %c0_3 = arith.constant 0 : index
    %c0_4 = arith.constant 0 : index
    %0 = vector.load %arg1[%c0, %c0_0, %c0_1, %c0_2, %c0_3, %c0_4] : memref<1x4x8x2x8x2xf32, #tpu.memory_space<vmem>>, vector<1x4x8x2x8x2xf32>
    %1 = vector.extract_strided_slice %0 {offsets = [0, 0, 0, 0, 0, 0], sizes = [1, 4, 8, 1, 8, 2], strides = [1, 1, 1, 1, 1, 1]} : vector<1x4x8x2x8x2xf32> to vector<1x4x8x1x8x2xf32>
    %2 = vector.shape_cast %1 : vector<1x4x8x1x8x2xf32> to vector<1x4x8x8x2xf32>
    %3 = vector.extract_strided_slice %0 {offsets = [0, 0, 0, 1, 0, 0], sizes = [1, 4, 8, 1, 8, 2], strides = [1, 1, 1, 1, 1, 1]} : vector<1x4x8x2x8x2xf32> to vector<1x4x8x1x8x2xf32>
    %4 = vector.shape_cast %3 : vector<1x4x8x1x8x2xf32> to vector<1x4x8x8x2xf32>
    %5 = arith.maximumf %2, %4 : vector<1x4x8x8x2xf32>
    %6 = vector.extract_strided_slice %5 {offsets = [0, 0, 0, 0, 0], sizes = [1, 4, 8, 8, 1], strides = [1, 1, 1, 1, 1]} : vector<1x4x8x8x2xf32> to vector<1x4x8x8x1xf32>
    %7 = vector.shape_cast %6 : vector<1x4x8x8x1xf32> to vector<1x4x8x8xf32>
    %8 = vector.extract_strided_slice %5 {offsets = [0, 0, 0, 0, 1], sizes = [1, 4, 8, 8, 1], strides = [1, 1, 1, 1, 1]} : vector<1x4x8x8x2xf32> to vector<1x4x8x8x1xf32>
    %9 = vector.shape_cast %8 : vector<1x4x8x8x1xf32> to vector<1x4x8x8xf32>
    %10 = arith.maximumf %7, %9 : vector<1x4x8x8xf32>
    %cst = arith.constant 0.000000e+00 : f32
    %11 = vector.broadcast %cst : f32 to vector<1x4x1x10xf32>
    %cst_5 = arith.constant 0.000000e+00 : f32
    %12 = vector.broadcast %cst_5 : f32 to vector<1x4x10x1xf32>
    %c0_6 = arith.constant 0 : index
    %c0_7 = arith.constant 0 : index
    %c0_8 = arith.constant 0 : index
    %c0_9 = arith.constant 0 : index
    %13 = vector.load %arg5[%c0_6, %c0_7, %c0_8, %c0_9] : memref<1x4x10x10xf32, #tpu.memory_space<vmem>>, vector<1x4x1x10xf32>
    tpu.vector_store %arg5[%c0_6, %c0_7, %c0_8, %c0_9], %11 {strides = array<i32>} : memref<1x4x10x10xf32, #tpu.memory_space<vmem>>, vector<1x4x1x10xf32>,
    %c0_10 = arith.constant 0 : index
    %c0_11 = arith.constant 0 : index
    %c9 = arith.constant 9 : index
    %c0_12 = arith.constant 0 : index
    %14 = vector.load %arg5[%c0_10, %c0_11, %c9, %c0_12] : memref<1x4x10x10xf32, #tpu.memory_space<vmem>>, vector<1x4x1x10xf32>
    tpu.vector_store %arg5[%c0_10, %c0_11, %c9, %c0_12], %11 {strides = array<i32>} : memref<1x4x10x10xf32, #tpu.memory_space<vmem>>, vector<1x4x1x10xf32>,
    %c0_13 = arith.constant 0 : index
    %c0_14 = arith.constant 0 : index
    %c0_15 = arith.constant 0 : index
    %c0_16 = arith.constant 0 : index
    %15 = vector.load %arg5[%c0_13, %c0_14, %c0_15, %c0_16] : memref<1x4x10x10xf32, #tpu.memory_space<vmem>>, vector<1x4x10x1xf32>
    tpu.vector_store %arg5[%c0_13, %c0_14, %c0_15, %c0_16], %12 {strides = array<i32>} : memref<1x4x10x10xf32, #tpu.memory_space<vmem>>, vector<1x4x10x1xf32>,
    %c0_17 = arith.constant 0 : index
    %c0_18 = arith.constant 0 : index
    %c0_19 = arith.constant 0 : index
    %c9_20 = arith.constant 9 : index
    %16 = vector.load %arg5[%c0_17, %c0_18, %c0_19, %c9_20] : memref<1x4x10x10xf32, #tpu.memory_space<vmem>>, vector<1x4x10x1xf32>
    tpu.vector_store %arg5[%c0_17, %c0_18, %c0_19, %c9_20], %12 {strides = array<i32>} : memref<1x4x10x10xf32, #tpu.memory_space<vmem>>, vector<1x4x10x1xf32>,
    %c0_21 = arith.constant 0 : index
    %c0_22 = arith.constant 0 : index
    %c1 = arith.constant 1 : index
    %c1_23 = arith.constant 1 : index
    %17 = vector.load %arg5[%c0_21, %c0_22, %c1, %c1_23] : memref<1x4x10x10xf32, #tpu.memory_space<vmem>>, vector<1x4x8x8xf32>
    tpu.vector_store %arg5[%c0_21, %c0_22, %c1, %c1_23], %10 {strides = array<i32>} : memref<1x4x10x10xf32, #tpu.memory_space<vmem>>, vector<1x4x8x8xf32>,
    %c0_24 = arith.constant 0 : index
    %c0_25 = arith.constant 0 : index
    %c0_26 = arith.constant 0 : index
    %c0_27 = arith.constant 0 : index
    %18 = vector.load %arg5[%c0_24, %c0_25, %c0_26, %c0_27] : memref<1x4x10x10xf32, #tpu.memory_space<vmem>>, vector<1x4x8x8xf32>
    %19 = vector.shape_cast %18 : vector<1x4x8x8xf32> to vector<1x4x64xf32>
    %c0_28 = arith.constant 0 : index
    %c0_29 = arith.constant 0 : index
    %c0_30 = arith.constant 0 : index
    %20 = vector.load %arg6[%c0_28, %c0_29, %c0_30] : memref<1x36x64xf32, #tpu.memory_space<vmem>>, vector<1x4x64xf32>
    tpu.vector_store %arg6[%c0_28, %c0_29, %c0_30], %19 {strides = array<i32>} : memref<1x36x64xf32, #tpu.memory_space<vmem>>, vector<1x4x64xf32>,
    %c0_31 = arith.constant 0 : index
    %c0_32 = arith.constant 0 : index
    %c0_33 = arith.constant 0 : index
    %c1_34 = arith.constant 1 : index
    %21 = vector.load %arg5[%c0_31, %c0_32, %c0_33, %c1_34] : memref<1x4x10x10xf32, #tpu.memory_space<vmem>>, vector<1x4x8x8xf32>
    %22 = vector.shape_cast %21 : vector<1x4x8x8xf32> to vector<1x4x64xf32>
    %c0_35 = arith.constant 0 : index
    %c4 = arith.constant 4 : index
    %c0_36 = arith.constant 0 : index
    %23 = vector.load %arg6[%c0_35, %c4, %c0_36] : memref<1x36x64xf32, #tpu.memory_space<vmem>>, vector<1x4x64xf32>
    tpu.vector_store %arg6[%c0_35, %c4, %c0_36], %22 {strides = array<i32>} : memref<1x36x64xf32, #tpu.memory_space<vmem>>, vector<1x4x64xf32>,
    %c0_37 = arith.constant 0 : index
    %c0_38 = arith.constant 0 : index
    %c0_39 = arith.constant 0 : index
    %c2 = arith.constant 2 : index
    %24 = vector.load %arg5[%c0_37, %c0_38, %c0_39, %c2] : memref<1x4x10x10xf32, #tpu.memory_space<vmem>>, vector<1x4x8x8xf32>
    %25 = vector.shape_cast %24 : vector<1x4x8x8xf32> to vector<1x4x64xf32>
    %c0_40 = arith.constant 0 : index
    %c8 = arith.constant 8 : index
    %c0_41 = arith.constant 0 : index
    %26 = vector.load %arg6[%c0_40, %c8, %c0_41] : memref<1x36x64xf32, #tpu.memory_space<vmem>>, vector<1x4x64xf32>
    tpu.vector_store %arg6[%c0_40, %c8, %c0_41], %25 {strides = array<i32>} : memref<1x36x64xf32, #tpu.memory_space<vmem>>, vector<1x4x64xf32>,
    %c0_42 = arith.constant 0 : index
    %c0_43 = arith.constant 0 : index
    %c1_44 = arith.constant 1 : index
    %c0_45 = arith.constant 0 : index
    %27 = vector.load %arg5[%c0_42, %c0_43, %c1_44, %c0_45] : memref<1x4x10x10xf32, #tpu.memory_space<vmem>>, vector<1x4x8x8xf32>
    %28 = vector.shape_cast %27 : vector<1x4x8x8xf32> to vector<1x4x64xf32>
    %c0_46 = arith.constant 0 : index
    %c12 = arith.constant 12 : index
    %c0_47 = arith.constant 0 : index
    %29 = vector.load %arg6[%c0_46, %c12, %c0_47] : memref<1x36x64xf32, #tpu.memory_space<vmem>>, vector<1x4x64xf32>
    tpu.vector_store %arg6[%c0_46, %c12, %c0_47], %28 {strides = array<i32>} : memref<1x36x64xf32, #tpu.memory_space<vmem>>, vector<1x4x64xf32>,
    %c0_48 = arith.constant 0 : index
    %c0_49 = arith.constant 0 : index
    %c1_50 = arith.constant 1 : index
    %c1_51 = arith.constant 1 : index
    %30 = vector.load %arg5[%c0_48, %c0_49, %c1_50, %c1_51] : memref<1x4x10x10xf32, #tpu.memory_space<vmem>>, vector<1x4x8x8xf32>
    %31 = vector.shape_cast %30 : vector<1x4x8x8xf32> to vector<1x4x64xf32>
    %c0_52 = arith.constant 0 : index
    %c16 = arith.constant 16 : index
    %c0_53 = arith.constant 0 : index
    %32 = vector.load %arg6[%c0_52, %c16, %c0_53] : memref<1x36x64xf32, #tpu.memory_space<vmem>>, vector<1x4x64xf32>
    tpu.vector_store %arg6[%c0_52, %c16, %c0_53], %31 {strides = array<i32>} : memref<1x36x64xf32, #tpu.memory_space<vmem>>, vector<1x4x64xf32>,
    %c0_54 = arith.constant 0 : index
    %c0_55 = arith.constant 0 : index
    %c1_56 = arith.constant 1 : index
    %c2_57 = arith.constant 2 : index
    %33 = vector.load %arg5[%c0_54, %c0_55, %c1_56, %c2_57] : memref<1x4x10x10xf32, #tpu.memory_space<vmem>>, vector<1x4x8x8xf32>
    %34 = vector.shape_cast %33 : vector<1x4x8x8xf32> to vector<1x4x64xf32>
    %c0_58 = arith.constant 0 : index
    %c20 = arith.constant 20 : index
    %c0_59 = arith.constant 0 : index
    %35 = vector.load %arg6[%c0_58, %c20, %c0_59] : memref<1x36x64xf32, #tpu.memory_space<vmem>>, vector<1x4x64xf32>
    tpu.vector_store %arg6[%c0_58, %c20, %c0_59], %34 {strides = array<i32>} : memref<1x36x64xf32, #tpu.memory_space<vmem>>, vector<1x4x64xf32>,
    %c0_60 = arith.constant 0 : index
    %c0_61 = arith.constant 0 : index
    %c2_62 = arith.constant 2 : index
    %c0_63 = arith.constant 0 : index
    %36 = vector.load %arg5[%c0_60, %c0_61, %c2_62, %c0_63] : memref<1x4x10x10xf32, #tpu.memory_space<vmem>>, vector<1x4x8x8xf32>
    %37 = vector.shape_cast %36 : vector<1x4x8x8xf32> to vector<1x4x64xf32>
    %c0_64 = arith.constant 0 : index
    %c24 = arith.constant 24 : index
    %c0_65 = arith.constant 0 : index
    %38 = vector.load %arg6[%c0_64, %c24, %c0_65] : memref<1x36x64xf32, #tpu.memory_space<vmem>>, vector<1x4x64xf32>
    tpu.vector_store %arg6[%c0_64, %c24, %c0_65], %37 {strides = array<i32>} : memref<1x36x64xf32, #tpu.memory_space<vmem>>, vector<1x4x64xf32>,
    %c0_66 = arith.constant 0 : index
    %c0_67 = arith.constant 0 : index
    %c2_68 = arith.constant 2 : index
    %c1_69 = arith.constant 1 : index
    %39 = vector.load %arg5[%c0_66, %c0_67, %c2_68, %c1_69] : memref<1x4x10x10xf32, #tpu.memory_space<vmem>>, vector<1x4x8x8xf32>
    %40 = vector.shape_cast %39 : vector<1x4x8x8xf32> to vector<1x4x64xf32>
    %c0_70 = arith.constant 0 : index
    %c28 = arith.constant 28 : index
    %c0_71 = arith.constant 0 : index
    %41 = vector.load %arg6[%c0_70, %c28, %c0_71] : memref<1x36x64xf32, #tpu.memory_space<vmem>>, vector<1x4x64xf32>
    tpu.vector_store %arg6[%c0_70, %c28, %c0_71], %40 {strides = array<i32>} : memref<1x36x64xf32, #tpu.memory_space<vmem>>, vector<1x4x64xf32>,
    %c0_72 = arith.constant 0 : index
    %c0_73 = arith.constant 0 : index
    %c2_74 = arith.constant 2 : index
    %c2_75 = arith.constant 2 : index
    %42 = vector.load %arg5[%c0_72, %c0_73, %c2_74, %c2_75] : memref<1x4x10x10xf32, #tpu.memory_space<vmem>>, vector<1x4x8x8xf32>
    %43 = vector.shape_cast %42 : vector<1x4x8x8xf32> to vector<1x4x64xf32>
    %c0_76 = arith.constant 0 : index
    %c32 = arith.constant 32 : index
    %c0_77 = arith.constant 0 : index
    %44 = vector.load %arg6[%c0_76, %c32, %c0_77] : memref<1x36x64xf32, #tpu.memory_space<vmem>>, vector<1x4x64xf32>
    tpu.vector_store %arg6[%c0_76, %c32, %c0_77], %43 {strides = array<i32>} : memref<1x36x64xf32, #tpu.memory_space<vmem>>, vector<1x4x64xf32>,
    %c0_78 = arith.constant 0 : index
    %c0_79 = arith.constant 0 : index
    %45 = vector.load %arg2[%c0_78, %c0_79] : memref<8x36xf32, #tpu.memory_space<vmem>>, vector<8x36xf32>
    %cst_80 = arith.constant 0.000000e+00 : f32
    %46 = vector.broadcast %cst_80 : f32 to vector<8x1xf32>
    %cst_81 = arith.constant 0.000000e+00 : f32
    %47 = vector.broadcast %cst_81 : f32 to vector<8x1xf32>
    %c0_82 = arith.constant 0 : index
    %c0_83 = arith.constant 0 : index
    %c0_84 = arith.constant 0 : index
    %48 = vector.load %arg6[%c0_82, %c0_83, %c0_84] : memref<1x36x64xf32, #tpu.memory_space<vmem>>, vector<1x36x64xf32>
    %49 = vector.shape_cast %48 : vector<1x36x64xf32> to vector<36x64xf32>
    %cst_85 = arith.constant dense<0.000000e+00> : vector<8x64xf32>
    %50 = tpu.matmul %45, %49, %cst_85 {dimension_numbers = #tpu.dot_dimension_numbers<[1], [0], [0], [1], [0, 0, 1, 1], [], []>} : vector<8x36xf32>, vector<36x64xf32>, vector<8x64xf32> -> vector<8x64xf32>
    %51 = arith.truncf %50 : vector<8x64xf32> to vector<8x64xbf16>
    %c0_86 = arith.constant 0 : index
    %c0_87 = arith.constant 0 : index
    %c0_88 = arith.constant 0 : index
    %52 = vector.load %arg3[%c0_86, %c0_87, %c0_88] : memref<1x8x64xbf16, #tpu.memory_space<vmem>>, vector<1x8x64xbf16>
    %53 = vector.shape_cast %52 : vector<1x8x64xbf16> to vector<8x64xbf16>
    %54 = vector.shape_cast %51 : vector<8x64xbf16> to vector<1x8x64xbf16>
    tpu.vector_store %arg3[%c0_86, %c0_87, %c0_88], %54 {strides = array<i32>} : memref<1x8x64xbf16, #tpu.memory_space<vmem>>, vector<1x8x64xbf16>,
    %cst_89 = arith.constant dense<0.000000e+00> : vector<8xf32>
    %55 = vector.multi_reduction <add>, %50, %cst_89 [1] : vector<8x64xf32> to vector<8xf32>
    %56 = vector.shape_cast %55 : vector<8xf32> to vector<8x1xf32>
    %57 = arith.addf %46, %56 : vector<8x1xf32>
    %58 = arith.mulf %50, %50 : vector<8x64xf32>
    %cst_90 = arith.constant dense<0.000000e+00> : vector<8xf32>
    %59 = vector.multi_reduction <add>, %58, %cst_90 [1] : vector<8x64xf32> to vector<8xf32>
    %60 = vector.shape_cast %59 : vector<8xf32> to vector<8x1xf32>
    %61 = arith.addf %47, %60 : vector<8x1xf32>
    %62 = tpu.concatenate %57, %61 in 1 : vector<8x1xf32>, vector<8x1xf32> -> vector<8x2xf32>
    %c0_91 = arith.constant 0 : index
    %c0_92 = arith.constant 0 : index
    %c0_93 = arith.constant 0 : index
    %63 = vector.load %arg4[%c0_91, %c0_92, %c0_93] : memref<1x8x2xf32, #tpu.memory_space<vmem>>, vector<1x8x2xf32>
    %64 = vector.shape_cast %63 : vector<1x8x2xf32> to vector<8x2xf32>
    %65 = vector.shape_cast %62 : vector<8x2xf32> to vector<1x8x2xf32>
    tpu.vector_store %arg4[%c0_91, %c0_92, %c0_93], %65 {strides = array<i32>} : memref<1x8x2xf32, #tpu.memory_space<vmem>>, vector<1x8x2xf32>,
    return
  }
  func.func @transform_0(%arg0: i32) -> (i32, i32, i32, i32, i32, i32) {
    %c0_i32 = arith.constant 0 : i32
    %c0_i32_0 = arith.constant 0 : i32
    %c0_i32_1 = arith.constant 0 : i32
    %c0_i32_2 = arith.constant 0 : i32
    %c0_i32_3 = arith.constant 0 : i32
    %c0_i32_4 = arith.constant 0 : i32
    return %arg0, %c0_i32, %c0_i32_0, %c0_i32_1, %c0_i32_2, %c0_i32_3 : i32, i32, i32, i32, i32, i32
  }
  func.func @transform_1(%arg0: i32) -> (i32, i32) {
    %c0_i32 = arith.constant 0 : i32
    %c0_i32_0 = arith.constant 0 : i32
    %c0_i32_1 = arith.constant 0 : i32
    return %c0_i32, %c0_i32_0 : i32, i32
  }
  func.func @transform_2(%arg0: i32) -> (i32, i32, i32) {
    %c0_i32 = arith.constant 0 : i32
    %c0_i32_0 = arith.constant 0 : i32
    %c0_i32_1 = arith.constant 0 : i32
    return %arg0, %c0_i32, %c0_i32_0 : i32, i32, i32
  }
  func.func @transform_3(%arg0: i32) -> (i32, i32, i32) {
    %c0_i32 = arith.constant 0 : i32
    %c0_i32_0 = arith.constant 0 : i32
    %c0_i32_1 = arith.constant 0 : i32
    return %arg0, %c0_i32, %c0_i32_0 : i32, i32, i32
  }
}

</mosaic_0001>

<bundles_post_ra>
// kernel: tpu_custom_call.1
= control target key start
LH: loop header
LB: loop body
LE: loop exit
PB: predicated region body
PF: predicated region fallthrough
CT: control target
= control target key end

     0   :  { %9 = vsyncpa [#allocation5], 0  ;;  %s2988_s0 = inlined_call_operand.vmem [shape: f32[2,4,8,2,8,2], index: 0, kind: input, shape index: {}]   ;;  %s2989_s1 = inlined_call_operand.vmem [shape: f32[8,36], index: 1, kind: input, shape index: {}]   ;;  %s2990_s2 = inlined_call_operand.hbm [shape: bf16[2,8,64], index: 2, kind: output, shape index: {0}]   ;;  %s2991_s3 = inlined_call_operand.vmem [shape: f32[2,8,2], index: 3, kind: output, shape index: {1}]  }
   0x1   :  { %11 = vsyncpa [#allocation5 + $0x1], 0  ;;  %s1963_s12 = smov 0   ;;  %s1965_s13 = smov 0  }
   0x2   :  { %s1967_s14 = smov 0   ;;  %s1969_s15 = smov 0  }
   0x3 LB: > { %s1984_s16 = sadd.s32 4294967295, %s1928_s15   ;;  %s1796_s17 = sadd.s32 4294967294, %s1928_s15   ;;  %s1928_s15 = sphi %s1969_s15, %s2997_s15   ;;  %s1924_s14 = sphi %s1967_s14, %s2996_s14   ;;  %s1920_s13 = sphi %s1965_s13, %s2995_s13   ;;  %s1916_s12 = sphi %s1963_s12, %s2994_s12  }
   0x4   : > { %s1988_s18 = sadd.s32 1, %s1928_s15   ;;  %s71_s19 = sadd.s32 1, %s1924_s14 }
   0x5   : > { %s68_s20 = ssub.s32 %s1928_s15, %s1988_s18  ;;  %p81_p0 = scmp.ne.s32.totalorder %s1924_s14, %s1920_s13 }
   0x6   : > { %p69_p1 = scmp.eq.s32.totalorder %s68_s20, 0  ;;  %p82_p2 = scmp.eq.s32.totalorder %s1984_s16, 1 }
   0x7   : > { %p87_p3 = scmp.ne.s32.totalorder %s1920_s13, %s1916_s12  ;;  %p88_p4 = scmp.eq.s32.totalorder %s1796_s17, 1 }
   0x8   : > { %s1999_s21 = scalar_select %p69_p1, %s1924_s14, %s71_s19  }
   0x9   : > { %p2001_p5 = por %p82_p2, %p81_p0  ;;  %p2005_p6 = por %p88_p4, %p87_p3 }
   0xa   : > { %p1799_p7 = scmp.ge.s32.totalorder %s1928_s15, 1  ;;  %p143_p8 = scmp.lt.s32.totalorder %s1928_s15, 3 }
   0xc   : > { %p144_p9 = pnand %p1799_p7, %p143_p8 }
   0xd   : > { %p171_p10 = scmp.lt.s32.totalorder (!%p144_p9), %s1984_s16, 1  ;;  %s1930_s29 = smov (!%p144_p9), 127  }
   0xe   : > { %147 = sbr.rel (%p144_p9) target bundleno = 1023 (0x3ff), region = 28  ;;  %s1933_s30 = smov (!%p144_p9), 126  }
   0xf   : > { %s1936_s4 = smov (!%p144_p9), 16   ;;  %s1937_s5 = smov (!%p144_p9), 24  }
  0x10   : > { %s1938_s6 = smov (!%p144_p9), 32   ;;  %s1939_s7 = smov (!%p144_p9), 8  }
  0x11   : > { %s1940_s8 = smov (!%p144_p9), 48   ;;  %s1941_s9 = smov (!%p144_p9), 40  }
  0x12   : > { %s1942_s10 = smov (!%p144_p9), 56   ;;  %s162_s19 = sand.u32 (!%p144_p9), 1, %s1920_s13  }
  0x13   : > { %s2013_s24 = scalar_select %p171_p10, %s1984_s16, 1  ;;  %vm436_vm0 = vcmask 73728   ;;  %vm445_vm1 = vcmask 7168   ;;  %vm447_vm2 = vcmask 1024   ;;  %vm455_vm3 = vcmask 80968  }
  0x14   : > { %vm457_vm4 = vcmask 74824   ;;  %vm628_vm5 = vcmask 1041409   ;;  %vm630_vm6 = vcmask 1042434   ;;  %vm632_vm7 = vcmask 1043459   ;;  %s1807_s20 = sshll.u32 %s1984_s16, 2  ;;  %s1691_s16 = scalar_lea.sflag [#allocation5], %s162_s19 }
  0x15   : > { %s1810_s25 = sshll.u32 %s2013_s24, 9  ;;  %vm634_vm8 = vcmask 1044484   ;;  %vm636_vm9 = vcmask 1045509   ;;  %vm638_vm10 = vcmask 1046534   ;;  %vm640_vm11 = vcmask 1047559  }
  0x16   : > { %s2019_s28 = scalar_lea.vmem %s2988_s0, %s1810_s25  ;;  %vm667_vm12 = vcmask 72712   ;;  %vm677_vm13 = vcmask 1047556   ;;  %vm761_vm14 = vcmask 64512   ;;  %vm763_vm15 = vcmask 130048   ;;  %s1800_s25 = sshll.u32 %s162_s19, 2 }
  0x17   : > { %v184_v0 = vld [vmem:[%s2019_s28 + $0x20] sm:$0xff]  ;;  %v185_v1 = vld [vmem:[%s2019_s28 + $0x28] sm:$0xff]  ;;  %v186_v6 = vld [vmem:[%s2019_s28 + $0x30] sm:$0xff] }
  0x18   : > { %v180_v2 = vld [vmem:[%s2019_s28] sm:$0xff]  ;;  %v2024_v3 = vmax.f32 %v184_v0, %v185_v1  ;;  %v181_v4 = vld [vmem:[%s2019_s28 + $0x8] sm:$0xff]  ;;  %v187_v7 = vld [vmem:[%s2019_s28 + $0x38] sm:$0xff] }
  0x19   : > { %v2027_v5 = vmax.f32 %v180_v2, %v181_v4  ;;  %v188_v8 = vld [vmem:[%s2019_s28 + $0x40] sm:$0xff]  ;;  %v189_v9 = vld [vmem:[%s2019_s28 + $0x48] sm:$0xff]  ;;  %v182_v10 = vld [vmem:[%s2019_s28 + $0x10] sm:$0xff]  ;;  %v2041_v13 = vmax.f32 %v186_v6, %v187_v7 }
  0x1a   : > { %312 = vrot.lane.b32.xlu1 %v2024_v3, %s1930_s29  ;;  %v183_v11 = vld [vmem:[%s2019_s28 + $0x18] sm:$0xff]  ;;  %v2039_v12 = vmax.f32 %v188_v8, %v189_v9  ;;  %v190_v15 = vld [vmem:[%s2019_s28 + $0x50] sm:$0xff]  ;;  %v192_v20 = vld [vmem:[%s2019_s28 + $0x60] sm:$0xff] }
  0x1b   : > { %308 = vrot.lane.b32.xlu0 %v2027_v5, %s1930_s29  ;;  %v2045_v14 = vmax.f32 %v182_v10, %v183_v11  ;;  %v191_v16 = vld [vmem:[%s2019_s28 + $0x58] sm:$0xff]  ;;  %v194_v18 = vld [vmem:[%s2019_s28 + $0x70] sm:$0xff]  ;;  %v193_v21 = vld [vmem:[%s2019_s28 + $0x68] sm:$0xff] }
  0x1c   : > { %316 = vrot.lane.b32.xlu2 %v2039_v12, %s1930_s29  ;;  %v2051_v17 = vmax.f32 %v190_v15, %v191_v16  ;;  %v195_v19 = vld [vmem:[%s2019_s28 + $0x78] sm:$0xff]  ;;  %v2063_v23 = vmax.f32 %v192_v20, %v193_v21  ;;  %v196_v24 = vld [vmem:[%s2019_s28 + $0x80] sm:$0xff]  ;;  %v197_v25 = vld [vmem:[%s2019_s28 + $0x88] sm:$0xff] }
  0x1d   : > { %v2059_v22 = vmax.f32 %v194_v18, %v195_v19  ;;  %v2069_v26 = vmax.f32 %v196_v24, %v197_v25  ;;  %v200_v27 = vld [vmem:[%s2019_s28 + $0xa0] sm:$0xff]  ;;  %v201_v28 = vld [vmem:[%s2019_s28 + $0xa8] sm:$0xff]  ;;  %v198_v29 = vld [vmem:[%s2019_s28 + $0x90] sm:$0xff] }
  0x1e   : > { %v199_v30 = vld [vmem:[%s2019_s28 + $0x98] sm:$0xff]  ;;  %v2077_v31 = vmax.f32 %v200_v27, %v201_v28  ;;  %v202_v33 = vld [vmem:[%s2019_s28 + $0xb0] sm:$0xff]  ;;  %v204_v38 = vld [vmem:[%s2019_s28 + $0xc0] sm:$0xff] }
  0x1f   : > { %v2081_v32 = vmax.f32 %v198_v29, %v199_v30  ;;  %v203_v34 = vld [vmem:[%s2019_s28 + $0xb8] sm:$0xff]  ;;  %v206_v36 = vld [vmem:[%s2019_s28 + $0xd0] sm:$0xff]  ;;  %v205_v39 = vld [vmem:[%s2019_s28 + $0xc8] sm:$0xff] }
  0x20   : > { %v2087_v35 = vmax.f32 %v202_v33, %v203_v34  ;;  %v207_v37 = vld [vmem:[%s2019_s28 + $0xd8] sm:$0xff]  ;;  %v2099_v41 = vmax.f32 %v204_v38, %v205_v39  ;;  %v208_v42 = vld [vmem:[%s2019_s28 + $0xe0] sm:$0xff]  ;;  %v209_v43 = vld [vmem:[%s2019_s28 + $0xe8] sm:$0xff] }
  0x21   : > { %v2095_v40 = vmax.f32 %v206_v36, %v207_v37  ;;  %v2105_v44 = vmax.f32 %v208_v42, %v209_v43  ;;  %v212_v45 = vld [vmem:[%s2019_s28 + $0x100] sm:$0xff]  ;;  %v213_v46 = vld [vmem:[%s2019_s28 + $0x108] sm:$0xff]  ;;  %v210_v47 = vld [vmem:[%s2019_s28 + $0xf0] sm:$0xff] }
  0x22   : > { %314 = vrot.lane.b32.xlu1 %v2041_v13, %s1930_s29  ;;  %v211_v48 = vld [vmem:[%s2019_s28 + $0xf8] sm:$0xff]  ;;  %v2113_v49 = vmax.f32 %v212_v45, %v213_v46  ;;  %v214_v51 = vld [vmem:[%s2019_s28 + $0x110] sm:$0xff]  ;;  %v216_v56 = vld [vmem:[%s2019_s28 + $0x120] sm:$0xff] }
  0x23   : > { %310 = vrot.lane.b32.xlu0 %v2045_v14, %s1930_s29  ;;  %v2117_v50 = vmax.f32 %v210_v47, %v211_v48  ;;  %v215_v52 = vld [vmem:[%s2019_s28 + $0x118] sm:$0xff]  ;;  %v218_v54 = vld [vmem:[%s2019_s28 + $0x130] sm:$0xff]  ;;  %v217_v57 = vld [vmem:[%s2019_s28 + $0x128] sm:$0xff]  ;;  %v1931_v47 = vmov 0  }
  0x24   : > { %318 = vrot.lane.b32.xlu2 %v2051_v17, %s1930_s29  ;;  %v2123_v53 = vmax.f32 %v214_v51, %v215_v52  ;;  %v219_v55 = vld [vmem:[%s2019_s28 + $0x138] sm:$0xff]  ;;  %v2135_v59 = vmax.f32 %v216_v56, %v217_v57  ;;  %v220_v60 = vld [vmem:[%s2019_s28 + $0x140] sm:$0xff]  ;;  %v221_v61 = vld [vmem:[%s2019_s28 + $0x148] sm:$0xff]  ;;  %1865 = vset.pattern.permute.xlu1 %v1931_v47 }
  0x25   : > { %v2131_v58 = vmax.f32 %v218_v54, %v219_v55  ;;  %v2141_v62 = vmax.f32 %v220_v60, %v221_v61  ;;  %v224_v63 = vld [vmem:[%s2019_s28 + $0x160] sm:$0xff]  ;;  %v225_v0 = vld [vmem:[%s2019_s28 + $0x168] sm:$0xff]  ;;  %v222_v1 = vld [vmem:[%s2019_s28 + $0x150] sm:$0xff]  ;;  %1863 = vset.pattern.permute.xlu2 %v1931_v47  ;;  %1864 = vset.pattern.permute.xlu0 %v1931_v47 }
  0x26   : > { %v223_v2 = vld [vmem:[%s2019_s28 + $0x158] sm:$0xff]  ;;  %v2149_v4 = vmax.f32 %v224_v63, %v225_v0  ;;  %v226_v7 = vld [vmem:[%s2019_s28 + $0x170] sm:$0xff]  ;;  %v228_v15 = vld [vmem:[%s2019_s28 + $0x180] sm:$0xff] }
  0x27   : > { %v2153_v6 = vmax.f32 %v222_v1, %v223_v2  ;;  %v227_v8 = vld [vmem:[%s2019_s28 + $0x178] sm:$0xff]  ;;  %v230_v10 = vld [vmem:[%s2019_s28 + $0x190] sm:$0xff]  ;;  %v229_v16 = vld [vmem:[%s2019_s28 + $0x188] sm:$0xff] }
  0x28   : > { %v2159_v9 = vmax.f32 %v226_v7, %v227_v8  ;;  %v231_v11 = vld [vmem:[%s2019_s28 + $0x198] sm:$0xff]  ;;  %v2171_v19 = vmax.f32 %v228_v15, %v229_v16  ;;  %v232_v20 = vld [vmem:[%s2019_s28 + $0x1a0] sm:$0xff]  ;;  %v233_v21 = vld [vmem:[%s2019_s28 + $0x1a8] sm:$0xff] }
  0x29   : > { %v2167_v18 = vmax.f32 %v230_v10, %v231_v11  ;;  %v2177_v24 = vmax.f32 %v232_v20, %v233_v21  ;;  %v236_v25 = vld [vmem:[%s2019_s28 + $0x1c0] sm:$0xff]  ;;  %v237_v27 = vld [vmem:[%s2019_s28 + $0x1c8] sm:$0xff]  ;;  %v234_v28 = vld [vmem:[%s2019_s28 + $0x1b0] sm:$0xff] }
  0x2a   : > { %322 = vrot.lane.b32.xlu1 %v2059_v22, %s1930_s29  ;;  %v235_v29 = vld [vmem:[%s2019_s28 + $0x1b8] sm:$0xff]  ;;  %v2185_v30 = vmax.f32 %v236_v25, %v237_v27  ;;  %v238_v34 = vld [vmem:[%s2019_s28 + $0x1d0] sm:$0xff]  ;;  %v240_v42 = vld [vmem:[%s2019_s28 + $0x1e0] sm:$0xff] }
  0x2b   : > { %320 = vrot.lane.b32.xlu0 %v2063_v23, %s1930_s29  ;;  %v2189_v33 = vmax.f32 %v234_v28, %v235_v29  ;;  %v239_v36 = vld [vmem:[%s2019_s28 + $0x1d8] sm:$0xff]  ;;  %v242_v38 = vld [vmem:[%s2019_s28 + $0x1f0] sm:$0xff]  ;;  %v241_v43 = vld [vmem:[%s2019_s28 + $0x1e8] sm:$0xff] }
  0x2c   : > { %324 = vrot.lane.b32.xlu2 %v2069_v26, %s1930_s29  ;;  %v2195_v37 = vmax.f32 %v238_v34, %v239_v36  ;;  %v243_v39 = vld [vmem:[%s2019_s28 + $0x1f8] sm:$0xff]  ;;  %v2207_v46 = vmax.f32 %v240_v42, %v241_v43  ;;  %s1705_s28 = scalar_lea.hbm %s2990_s2, %s1807_s20 }
  0x2d   : > { %v2203_v45 = vmax.f32 %v242_v38, %v243_v39 }
  0x32   : > { %328 = vrot.lane.b32.xlu1 %v2077_v31, %s1930_s29 }
  0x33   : > { %326 = vrot.lane.b32.xlu0 %v2081_v32, %s1930_s29 }
  0x34   : > { %330 = vrot.lane.b32.xlu2 %v2087_v35, %s1930_s29 }
  0x3a   : > { %334 = vrot.lane.b32.xlu1 %v2095_v40, %s1930_s29 }
  0x3b   : > { %332 = vrot.lane.b32.xlu0 %v2099_v41, %s1930_s29 }
  0x3c   : > { %336 = vrot.lane.b32.xlu2 %v2105_v44, %s1930_s29 }
  0x42   : > { %340 = vrot.lane.b32.xlu1 %v2113_v49, %s1930_s29 }
  0x43   : > { %338 = vrot.lane.b32.xlu0 %v2117_v50, %s1930_s29 }
  0x44   : > { %342 = vrot.lane.b32.xlu2 %v2123_v53, %s1930_s29 }
  0x4a   : > { %346 = vrot.lane.b32.xlu1 %v2131_v58, %s1930_s29 }
  0x4b   : > { %344 = vrot.lane.b32.xlu0 %v2135_v59, %s1930_s29 }
  0x4c   : > { %348 = vrot.lane.b32.xlu2 %v2141_v62, %s1930_s29 }
  0x52   : > { %352 = vrot.lane.b32.xlu1 %v2149_v4, %s1930_s29 }
  0x53   : > { %350 = vrot.lane.b32.xlu0 %v2153_v6, %s1930_s29 }
  0x54   : > { %354 = vrot.lane.b32.xlu2 %v2159_v9, %s1930_s29 }
  0x5a   : > { %358 = vrot.lane.b32.xlu1 %v2167_v18, %s1930_s29 }
  0x5b   : > { %356 = vrot.lane.b32.xlu0 %v2171_v19, %s1930_s29 }
  0x5c   : > { %360 = vrot.lane.b32.xlu2 %v2177_v24, %s1930_s29 }
  0x62   : > { %364 = vrot.lane.b32.xlu1 %v2185_v30, %s1930_s29 }
  0x63   : > { %362 = vrot.lane.b32.xlu0 %v2189_v33, %s1930_s29 }
  0x64   : > { %366 = vrot.lane.b32.xlu2 %v2195_v37, %s1930_s29 }
  0x6a   : > { %370 = vrot.lane.b32.xlu1 %v2203_v45, %s1930_s29 }
  0x6b   : > { %368 = vrot.lane.b32.xlu0 %v2207_v46, %s1930_s29 }
  0x76   : > { %v317_v48 = vpop.permute.xlu2 %316 }
  0x77   : > { %v408_v60 = vmax.f32 %v2039_v12, %v317_v48 }
  0x7e   : > { %v319_v51 = vpop.permute.xlu2 %318 }
  0x7f   : > { %v409_v7 = vmax.f32 %v2051_v17, %v319_v51 }
  0x86   : > { %v325_v52 = vpop.permute.xlu2 %324 }
  0x8c   : > { %v313_v54 = vpop.permute.xlu1 %312 }
  0x8d   : > { %v406_v55 = vmax.f32 %v2024_v3, %v313_v54  ;;  %v309_v56 = vpop.permute.xlu0 %308 }
  0x8e   : > { %v404_v57 = vmax.f32 %v2027_v5, %v309_v56  ;;  %v331_v1 = vpop.permute.xlu2 %330 }
  0x8f   : > { %504 = vperm.xlu1 %1865, %v406_v55  }
  0x90   : > { %498 = vperm.xlu2 %1863, %v404_v57  }
  0x94   : > { %v315_v61 = vpop.permute.xlu1 %314 }
  0x95   : > { %v407_v63 = vmax.f32 %v2041_v13, %v315_v61  ;;  %v311_v0 = vpop.permute.xlu0 %310  ;;  %v412_v13 = vmax.f32 %v2069_v26, %v325_v52 }
  0x96   : > { %v405_v2 = vmax.f32 %v2045_v14, %v311_v0  ;;  %v337_v12 = vpop.permute.xlu2 %336 }
  0x97   : > { %510 = vperm.xlu1 %1865, %v408_v60  }
  0x98   : > { %507 = vperm.xlu2 %1863, %v407_v63   ;;  %501 = vperm.xlu0 %1864, %v405_v2  }
  0x9c   : > { %v323_v3 = vpop.permute.xlu1 %322 }
  0x9d   : > { %v411_v8 = vmax.f32 %v2059_v22, %v323_v3  ;;  %v321_v5 = vpop.permute.xlu0 %320  ;;  %v415_v22 = vmax.f32 %v2087_v35, %v331_v1 }
  0x9e   : > { %v410_v10 = vmax.f32 %v2063_v23, %v321_v5  ;;  %v343_v17 = vpop.permute.xlu2 %342 }
  0x9f   : > { %519 = vperm.xlu1 %1865, %v411_v8   ;;  %v421_v35 = vmax.f32 %v2123_v53, %v343_v17 }
  0xa0   : > { %513 = vperm.xlu2 %1863, %v409_v7   ;;  %516 = vperm.xlu0 %1864, %v410_v10  }
  0xa4   : > { %v329_v11 = vpop.permute.xlu1 %328 }
  0xa5   : > { %v414_v14 = vmax.f32 %v2077_v31, %v329_v11  ;;  %v327_v15 = vpop.permute.xlu0 %326  ;;  %v418_v31 = vmax.f32 %v2105_v44, %v337_v12 }
  0xa6   : > { %v413_v16 = vmax.f32 %v2081_v32, %v327_v15  ;;  %v349_v26 = vpop.permute.xlu2 %348 }
  0xa7   : > { %528 = vperm.xlu1 %1865, %v414_v14   ;;  %v424_v44 = vmax.f32 %v2141_v62, %v349_v26 }
  0xa8   : > { %522 = vperm.xlu2 %1863, %v412_v13   ;;  %525 = vperm.xlu0 %1864, %v413_v16  }
  0xac   : > { %v335_v20 = vpop.permute.xlu1 %334 }
  0xad   : > { %v417_v23 = vmax.f32 %v2095_v40, %v335_v20  ;;  %v333_v21 = vpop.permute.xlu0 %332 }
  0xae   : > { %v416_v25 = vmax.f32 %v2099_v41, %v333_v21  ;;  %v355_v36 = vpop.permute.xlu2 %354 }
  0xaf   : > { %537 = vperm.xlu1 %1865, %v417_v23  }
  0xb0   : > { %531 = vperm.xlu2 %1863, %v415_v22   ;;  %534 = vperm.xlu0 %1864, %v416_v25  }
  0xb4   : > { %v341_v27 = vpop.permute.xlu1 %340 }
  0xb5   : > { %v420_v32 = vmax.f32 %v2113_v49, %v341_v27  ;;  %v339_v28 = vpop.permute.xlu0 %338 }
  0xb6   : > { %v419_v29 = vmax.f32 %v2117_v50, %v339_v28  ;;  %v361_v42 = vpop.permute.xlu2 %360 }
  0xb7   : > { %546 = vperm.xlu1 %1865, %v420_v32   ;;  %v430_v53 = vmax.f32 %v2177_v24, %v361_v42 }
  0xb8   : > { %540 = vperm.xlu2 %1863, %v418_v31   ;;  %543 = vperm.xlu0 %1864, %v419_v29  }
  0xbc   : > { %v347_v40 = vpop.permute.xlu1 %346 }
  0xbd   : > { %v423_v41 = vmax.f32 %v2131_v58, %v347_v40  ;;  %v345_v34 = vpop.permute.xlu0 %344 }
  0xbe   : > { %v422_v38 = vmax.f32 %v2135_v59, %v345_v34  ;;  %v367_v48 = vpop.permute.xlu2 %366 }
  0xbf   : > { %555 = vperm.xlu1 %1865, %v423_v41   ;;  %v433_v62 = vmax.f32 %v2195_v37, %v367_v48  ;;  %v427_v37 = vmax.f32 %v2159_v9, %v355_v36  ;;  %v593_v9 = vlaneseq }
  0xc0   : > { %549 = vperm.xlu2 %1863, %v421_v35   ;;  %552 = vperm.xlu0 %1864, %v422_v38  }
  0xc1   : > { %v594_v57 = vand.u32 127, %v593_v9 }
  0xc3   : > { %v2264_v60 = vadd.s32 4294967295, %v594_v57 }
  0xc4   : > { %v353_v49 = vpop.permute.xlu1 %352 }
  0xc5   : > { %v351_v39 = vpop.permute.xlu0 %350 }
  0xc6   : > { %v425_v50 = vmax.f32 %v2153_v6, %v351_v39 }
  0xc8   : > { %558 = vperm.xlu2 %1863, %v424_v44   ;;  %561 = vperm.xlu0 %1864, %v425_v50  }
  0xcc   : > { %v359_v43 = vpop.permute.xlu1 %358 }
  0xcd   : > { %v429_v58 = vmax.f32 %v2167_v18, %v359_v43  ;;  %v357_v47 = vpop.permute.xlu0 %356  ;;  %v426_v18 = vmax.f32 %v2149_v4, %v353_v49 }
  0xce   : > { %v428_v59 = vmax.f32 %v2171_v19, %v357_v47 }
  0xd0   : > { %573 = vperm.xlu2 %1863, %v429_v58   ;;  %576 = vperm.xlu0 %1864, %v430_v53  }
  0xd1   : > { %570 = vperm.xlu1 %1865, %v428_v59  }
  0xd4   : > { %v365_v51 = vpop.permute.xlu1 %364 }
  0xd5   : > { %v432_v6 = vmax.f32 %v2185_v30, %v365_v51  ;;  %v363_v52 = vpop.permute.xlu0 %362 }
  0xd6   : > { %v431_v54 = vmax.f32 %v2189_v33, %v363_v52  ;;  %v1932_v33 = vmov 0.0  }
  0xd7   : > { %437 = vst.msk [vmem:[#allocation2] sm:$0x1] %vm436_vm0, %v1932_v33 }
  0xd8   : > { %582 = vperm.xlu2 %1863, %v432_v6   ;;  %585 = vperm.xlu0 %1864, %v433_v62   ;;  %441 = vst.msk [vmem:[#allocation2 + $0x9] sm:$0x1] %vm436_vm0, %v1932_v33 }
  0xd9   : > { %579 = vperm.xlu1 %1865, %v431_v54   ;;  %446 = vst.msk [vmem:[#allocation2] sm:$0xff] %vm445_vm1, %v1932_v33 }
  0xda   : > { %448 = vst.msk [vmem:[#allocation2 + $0x8] sm:$0x3] %vm447_vm2, %v1932_v33 }
  0xdb   : > { %456 = vst.msk [vmem:[#allocation2] sm:$0xff] %vm455_vm3, %v1932_v33 }
  0xdc   : > { %v371_v24 = vpop.permute.xlu1 %370  ;;  %458 = vst.msk [vmem:[#allocation2 + $0x8] sm:$0x3] %vm457_vm4, %v1932_v33 }
  0xdd   : > { %v435_v19 = vmax.f32 %v2203_v45, %v371_v24  ;;  %v369_v55 = vpop.permute.xlu0 %368  ;;  %438 = vst.msk [vmem:[#allocation2 + $0x10] sm:$0x1] %vm436_vm0, %v1932_v33 }
  0xde   : > { %v434_v56 = vmax.f32 %v2207_v46, %v369_v55  ;;  %439 = vst.msk [vmem:[#allocation2 + $0x20] sm:$0x1] %vm436_vm0, %v1932_v33 }
  0xdf   : > { %440 = vst.msk [vmem:[#allocation2 + $0x30] sm:$0x1] %vm436_vm0, %v1932_v33 }
  0xe0   : > { %591 = vperm.xlu2 %1863, %v435_v19   ;;  %564 = vperm.xlu0 %1864, %v426_v18   ;;  %442 = vst.msk [vmem:[#allocation2 + $0x19] sm:$0x1] %vm436_vm0, %v1932_v33 }
  0xe1   : > { %588 = vperm.xlu1 %1865, %v434_v56   ;;  %443 = vst.msk [vmem:[#allocation2 + $0x29] sm:$0x1] %vm436_vm0, %v1932_v33 }
  0xe2   : > { %444 = vst.msk [vmem:[#allocation2 + $0x39] sm:$0x1] %vm436_vm0, %v1932_v33  ;;  %vm765_vm0 = vcmask 195584  }
  0xe3   : > { %449 = vst.msk [vmem:[#allocation2 + $0x10] sm:$0xff] %vm445_vm1, %v1932_v33 }
  0xe4   : > { %450 = vst.msk [vmem:[#allocation2 + $0x18] sm:$0x3] %vm447_vm2, %v1932_v33 }
  0xe5   : > { %451 = vst.msk [vmem:[#allocation2 + $0x20] sm:$0xff] %vm445_vm1, %v1932_v33 }
  0xe6   : > { %452 = vst.msk [vmem:[#allocation2 + $0x28] sm:$0x3] %vm447_vm2, %v1932_v33 }
  0xe7   : > { %453 = vst.msk [vmem:[#allocation2 + $0x30] sm:$0xff] %vm445_vm1, %v1932_v33 }
  0xe8   : > { %454 = vst.msk [vmem:[#allocation2 + $0x38] sm:$0x3] %vm447_vm2, %v1932_v33  ;;  %vm767_vm2 = vcmask 261120  }
  0xe9   : > { %567 = vperm.xlu1 %1865, %v427_v37   ;;  %459 = vst.msk [vmem:[#allocation2 + $0x10] sm:$0xff] %vm455_vm3, %v1932_v33 }
  0xea   : > { %v499_v30 = vpop.permute.xlu2 %498  ;;  %460 = vst.msk [vmem:[#allocation2 + $0x18] sm:$0x3] %vm457_vm4, %v1932_v33 }
  0xeb   : > { %461 = vst.msk [vmem:[#allocation2 + $0x20] sm:$0xff] %vm455_vm3, %v1932_v33  ;;  %v596_v2 = vperm.slane %v499_v30, %v2264_v60 }
  0xec   : > { %462 = vst.msk [vmem:[#allocation2 + $0x28] sm:$0x3] %vm457_vm4, %v1932_v33 }
  0xed   : > { %463 = vst.msk [vmem:[#allocation2 + $0x30] sm:$0xff] %vm455_vm3, %v1932_v33  ;;  %vm769_vm3 = vcmask 326656  }
  0xee   : > { %464 = vst.msk [vmem:[#allocation2 + $0x38] sm:$0x3] %vm457_vm4, %v1932_v33  ;;  %vm771_vm4 = vcmask 392192  }
  0xf2   : > { %v508_v4 = vpop.permute.xlu2 %507 }
  0xf3   : > { %v599_v3 = vperm.slane %v508_v4, %v2264_v60 }
  0xfa   : > { %v514_v45 = vpop.permute.xlu2 %513 }
  0xfb   : > { %v601_v14 = vperm.slane %v514_v45, %v2264_v60 }
 0x101   : > { %v505_v46 = vpop.permute.xlu1 %504 }
 0x102   : > { %v598_v63 = vperm.slane %v505_v46, %v2264_v60  ;;  %v523_v0 = vpop.permute.xlu2 %522 }
 0x103   : > { %v604_v27 = vperm.slane %v523_v0, %v2264_v60 }
 0x109   : > { %v511_v61 = vpop.permute.xlu1 %510 }
 0x10a   : > { %v502_v1 = vpop.permute.xlu0 %501  ;;  %v600_v10 = vperm.slane %v511_v61, %v2264_v60  ;;  %v532_v22 = vpop.permute.xlu2 %531 }
 0x10b   : > { %v597_v7 = vperm.slane %v502_v1, %v2264_v60  ;;  %v607_v34 = vperm.slane %v532_v22, %v2264_v60 }
 0x10d   : > { %v629_v8 = vsel %vm628_vm5, %v597_v7, %v596_v2 }
 0x10e   : > { %v631_v5 = vsel %vm630_vm6, %v598_v63, %v629_v8 }
 0x10f   : > { %v633_v12 = vsel %vm632_vm7, %v599_v3, %v631_v5 }
 0x110   : > { %v635_v11 = vsel %vm634_vm8, %v600_v10, %v633_v12 }
 0x111   : > { %v520_v13 = vpop.permute.xlu1 %519  ;;  %v637_v20 = vsel %vm636_vm9, %v601_v14, %v635_v11 }
 0x112   : > { %v603_v15 = vperm.slane %v520_v13, %v2264_v60  ;;  %v517_v16 = vpop.permute.xlu0 %516  ;;  %v541_v32 = vpop.permute.xlu2 %540 }
 0x113   : > { %v602_v17 = vperm.slane %v517_v16, %v2264_v60  ;;  %v610_v53 = vperm.slane %v541_v32, %v2264_v60 }
 0x115   : > { %v639_v23 = vsel %vm638_vm10, %v602_v17, %v637_v20 }
 0x116   : > { %v641_v21 = vsel %vm640_vm11, %v603_v15, %v639_v23 }
 0x117   : > { %668 = vst.msk [vmem:[#allocation2 + $0x1] sm:$0xff] %vm667_vm12, %v641_v21 }
 0x119   : > { %v529_v25 = vpop.permute.xlu1 %528 }
 0x11a   : > { %v526_v26 = vpop.permute.xlu0 %525  ;;  %v606_v28 = vperm.slane %v529_v25, %v2264_v60  ;;  %v550_v39 = vpop.permute.xlu2 %549 }
 0x11b   : > { %v605_v31 = vperm.slane %v526_v26, %v2264_v60  ;;  %v613_v51 = vperm.slane %v550_v39, %v2264_v60 }
 0x11d   : > { %v642_v29 = vsel %vm628_vm5, %v605_v31, %v604_v27 }
 0x11e   : > { %v643_v40 = vsel %vm630_vm6, %v606_v28, %v642_v29 }
 0x11f   : > { %v644_v44 = vsel %vm632_vm7, %v607_v34, %v643_v40  ;;  %v1934_v40 = vmov 1983009808  }
 0x121   : > { %v538_v35 = vpop.permute.xlu1 %537 }
 0x122   : > { %v535_v41 = vpop.permute.xlu0 %534  ;;  %v609_v38 = vperm.slane %v538_v35, %v2264_v60  ;;  %v559_v6 = vpop.permute.xlu2 %558 }
 0x123   : > { %v608_v36 = vperm.slane %v535_v41, %v2264_v60  ;;  %v616_v19 = vperm.slane %v559_v6, %v2264_v60 }
 0x125   : > { %v645_v49 = vsel %vm634_vm8, %v608_v36, %v644_v44  ;;  %v2349_v36 = vld [vmem:[#allocation2] sm:$0xff] }
 0x126   : > { %v646_v50 = vsel %vm636_vm9, %v609_v38, %v645_v49  ;;  %v1529_v44 = vld [vmem:[#allocation2 + $0x2] sm:$0xff] }
 0x127   : > { %v647_v47 = vsel %vm638_vm10, %v610_v53, %v646_v50  ;;  %v679_v50 = vrot.slane %v2349_v36, 4 }
 0x129   : > { %v547_v42 = vpop.permute.xlu1 %546 }
 0x12a   : > { %v544_v43 = vpop.permute.xlu0 %543  ;;  %v612_v48 = vperm.slane %v547_v42, %v2264_v60  ;;  %v574_v45 = vpop.permute.xlu2 %573 }
 0x12b   : > { %v611_v58 = vperm.slane %v544_v43, %v2264_v60  ;;  %v621_v63 = vperm.slane %v574_v45, %v2264_v60 }
 0x12c   : > { %v649_v24 = vsel %vm628_vm5, %v613_v51, %v612_v48 }
 0x12d   : > { %v648_v59 = vsel %vm640_vm11, %v611_v58, %v647_v47 }
 0x12e   : > { %669 = vst.msk [vmem:[#allocation2 + $0x11] sm:$0xff] %vm667_vm12, %v648_v59 }
 0x131   : > { %v556_v62 = vpop.permute.xlu1 %555 }
 0x132   : > { %v615_v52 = vperm.slane %v556_v62, %v2264_v60  ;;  %v553_v54 = vpop.permute.xlu0 %552  ;;  %v583_v7 = vpop.permute.xlu2 %582 }
 0x133   : > { %v614_v18 = vperm.slane %v553_v54, %v2264_v60  ;;  %v624_v10 = vperm.slane %v583_v7, %v2264_v60 }
 0x135   : > { %v650_v55 = vsel %vm630_vm6, %v614_v18, %v649_v24  ;;  %v2310_v56 = vld [vmem:[#allocation2 + $0x12] sm:$0xff] }
 0x136   : > { %v651_v37 = vsel %vm632_vm7, %v615_v52, %v650_v55  ;;  %1539 = vrot.lane.b32.xlu1 %v2310_v56, %s1933_s30  ;;  %v2345_v35 = vld [vmem:[#allocation2 + $0x10] sm:$0xff]  ;;  %v1097_v55 = vld [vmem:[#allocation2 + $0x1] sm:$0xff] }
 0x137   : > { %v652_v30 = vsel %vm634_vm8, %v616_v19, %v651_v37  ;;  %v691_v38 = vrot.slane %v2345_v35, 4  ;;  %v2377_v6 = vld [vmem:[#allocation2 + $0x11] sm:$0xff] }
 0x13a   : > { %v562_v33 = vpop.permute.xlu0 %561  ;;  %v592_v15 = vpop.permute.xlu2 %591 }
 0x13b   : > { %v617_v4 = vperm.slane %v562_v33, %v2264_v60  ;;  %v627_v22 = vperm.slane %v592_v15, %v2264_v60  ;;  %v1339_v33 = vrot.slane %v2310_v56, 4 }
 0x13d   : > { %v653_v9 = vsel %vm636_vm9, %v617_v4, %v652_v30 }
 0x142   : > { %v577_v46 = vpop.permute.xlu0 %576 }
 0x143   : > { %v571_v57 = vpop.permute.xlu1 %570  ;;  %v622_v61 = vperm.slane %v577_v46, %v2264_v60 }
 0x144   : > { %v620_v0 = vperm.slane %v571_v57, %v2264_v60 }
 0x146   : > { %v656_v1 = vsel %vm628_vm5, %v621_v63, %v620_v0  ;;  %vm773_vm5 = vcmask 457728  }
 0x147   : > { %v657_v2 = vsel %vm630_vm6, %v622_v61, %v656_v1  ;;  %v1327_v61 = vrot.slane %v1529_v44, 4  ;;  %vm775_vm6 = vcmask 519168  }
 0x14a   : > { %v586_v8 = vpop.permute.xlu0 %585 }
 0x14b   : > { %v580_v3 = vpop.permute.xlu1 %579  ;;  %v625_v13 = vperm.slane %v586_v8, %v2264_v60 }
 0x14c   : > { %v623_v5 = vperm.slane %v580_v3, %v2264_v60 }
 0x14e   : > { %v658_v12 = vsel %vm632_vm7, %v623_v5, %v657_v2  ;;  %vm1651_vm7 = vcmask 1043456  }
 0x14f   : > { %v659_v11 = vsel %vm634_vm8, %v624_v10, %v658_v12  ;;  %vm1647_vm8 = vcmask 293888  }
 0x150   : > { %v660_v14 = vsel %vm636_vm9, %v625_v13, %v659_v11  ;;  %vm1677_vm9 = vcmask 523264  }
 0x152   : > { %v565_v23 = vpop.permute.xlu0 %564 }
 0x153   : > { %v589_v16 = vpop.permute.xlu1 %588  ;;  %v618_v25 = vperm.slane %v565_v23, %v2264_v60 }
 0x154   : > { %v626_v17 = vperm.slane %v589_v16, %v2264_v60 }
 0x155   : > { %v654_v27 = vsel %vm638_vm10, %v618_v25, %v653_v9  ;;  %v1935_v9 = vmov 1934713408  }
 0x156   : > { %v661_v20 = vsel %vm638_vm10, %v626_v17, %v660_v14  ;;  %v706_v45 = vunpack.c.l.s4 %v1935_v9 }
 0x157   : > { %v662_v21 = vsel %vm640_vm11, %v627_v22, %v661_v20 }
 0x158   : > { %671 = vst.msk [vmem:[#allocation2 + $0x31] sm:$0xff] %vm667_vm12, %v662_v21  ;;  %v2414_v3 = vunpack.c.0.s8 %v706_v45 }
 0x15b   : > { %v568_v26 = vpop.permute.xlu1 %567 }
 0x15c   : > { %v619_v31 = vperm.slane %v568_v26, %v2264_v60  ;;  %v682_v60 = vunpack.c.l.s4 %v1934_v40  ;;  %v1019_v40 = vrot.slane %v2377_v6, 4 }
 0x15e   : > { %v655_v32 = vsel %vm640_vm11, %v619_v31, %v654_v27  ;;  %v2355_v39 = vunpack.c.0.s8 %v682_v60 }
 0x15f   : > { %670 = vst.msk [vmem:[#allocation2 + $0x21] sm:$0xff] %vm667_vm12, %v655_v32  ;;  %v1532_v28 = vld [vmem:[#allocation2 + $0x32] sm:$0xff] }
 0x160   : > { %v2339_v29 = vld [vmem:[#allocation2 + $0x31] sm:$0xff]  ;;  %1543 = vrot.lane.b32.xlu2 %v1532_v28, %s1933_s30  ;;  %1431 = vrot.lane.b32.xlu0 %v1532_v28, %s1930_s29  ;;  %v1337_v18 = vrot.slane %v1532_v28, 4  ;;  %v1340_v63 = vsel %vm677_vm13, %v1532_v28, %v1339_v33 }
 0x161   : > { %1223 = vrot.lane.b32.xlu1 %v2339_v29, %s1933_s30  ;;  %v2347_v34 = vld [vmem:[#allocation2 + $0x30] sm:$0xff]  ;;  %v1017_v30 = vrot.slane %v2339_v29, 4  ;;  %v1348_v8 = vperm.slane %v1340_v63, %v2355_v39 }
 0x162   : > { %v692_v42 = vsel %vm677_vm13, %v2347_v34, %v691_v38  ;;  %v1338_v37 = vsel %vm677_vm13, %v1337_v18, %v2310_v56  ;;  %v689_v16 = vrot.slane %v2347_v34, 4 }
 0x163   : > { %v700_v43 = vperm.slane %v692_v42, %v2355_v39  ;;  %v1344_v57 = vperm.slane %v1338_v37, %v2355_v39  ;;  %v1018_v0 = vsel %vm677_vm13, %v1017_v30, %v2377_v6  ;;  %v1361_v14 = vrot.slane %v1348_v8, 4 }
 0x164   : > { %v1024_v5 = vperm.slane %v1018_v0, %v2355_v39  ;;  %v690_v26 = vsel %vm677_vm13, %v689_v16, %v2345_v35 }
 0x165   : > { %v713_v59 = vrot.slane %v700_v43, 4 }
 0x166   : > { %v1531_v41 = vld [vmem:[#allocation2 + $0x22] sm:$0xff]  ;;  %v1029_v15 = vrot.slane %v1024_v5, 4 }
 0x167   : > { %v891_v49 = vld [vmem:[#allocation2 + $0x20] sm:$0xff]  ;;  %v1325_v52 = vrot.slane %v1531_v41, 4  ;;  %v1328_v2 = vsel %vm677_vm13, %v1531_v41, %v1327_v61 }
 0x168   : > { %1111 = vrot.lane.b32.xlu0 %v2339_v29, %s1930_s29  ;;  %1541 = vrot.lane.b32.xlu2 %v1531_v41, %s1933_s30  ;;  %v680_v53 = vsel %vm677_vm13, %v891_v49, %v679_v50  ;;  %v2367_v47 = vld [vmem:[#allocation2 + $0x21] sm:$0xff]  ;;  %v676_v7 = vrot.slane %v891_v49, 4  ;;  %v1336_v12 = vperm.slane %v1328_v2, %v2355_v39 }
 0x169   : > { %1537 = vrot.lane.b32.xlu1 %v1529_v44, %s1933_s30  ;;  %v688_v58 = vperm.slane %v680_v53, %v2355_v39  ;;  %v1326_v54 = vsel %vm677_vm13, %v1325_v52, %v1529_v44  ;;  %v1005_v19 = vrot.slane %v2367_v47, 4 }
 0x16a   : > { %v1332_v24 = vperm.slane %v1326_v54, %v2355_v39  ;;  %v678_v11 = vsel %vm677_vm13, %v676_v7, %v2349_v36  ;;  %v1362_v22 = vsel %vm677_vm13, %v1361_v14, %v1336_v12  ;;  %v1363_v60 = vrot.slane %v1336_v12, 4 }
 0x16b   : > { %v2372_v48 = vsel %vm677_vm13, %v713_v59, %v688_v58  ;;  %v715_v62 = vrot.slane %v688_v58, 4  ;;  %v1006_v46 = vsel %vm677_vm13, %v1005_v19, %v1097_v55  ;;  %v684_v20 = vperm.slane %v678_v11, %v2355_v39 }
 0x16c   : > { %v1351_v4 = vrot.slane %v1332_v24, 4  ;;  %v1368_v25 = vperm.slane %v1362_v22, %v2414_v3  ;;  %v720_v2 = vperm.slane %v2372_v48, %v2414_v3 }
 0x16d   : > { %v2375_v51 = vsel %vm677_vm13, %v700_v43, %v715_v62  ;;  %v703_v28 = vrot.slane %v684_v20, 4 }
 0x16e   : > { %v1352_v1 = vsel %vm677_vm13, %v1344_v57, %v1351_v4  ;;  %v1377_v52 = vrot.slane %v1368_v25, 4 }
 0x16f   : > { %v1360_v10 = vperm.slane %v1352_v1, %v2414_v3 }
 0x170   : > { %1427 = vrot.lane.b32.xlu2 %v2310_v56, %s1930_s29  ;;  %1429 = vrot.lane.b32.xlu0 %v1531_v41, %s1930_s29  ;;  %v1012_v56 = vperm.slane %v1006_v46, %v2355_v39  ;;  %v1007_v41 = vrot.slane %v1097_v55, 4 }
 0x171   : > { %1109 = vrot.lane.b32.xlu1 %v2367_v47, %s1930_s29  ;;  %v1375_v17 = vrot.slane %v1360_v10, 4 }
 0x172   : > { %v1031_v13 = vrot.slane %v1012_v56, 4  ;;  %v1030_v21 = vsel %vm677_vm13, %v1029_v15, %v1012_v56  ;;  %v1008_v50 = vsel %vm677_vm13, %v2367_v47, %v1007_v41 }
 0x173   : > { %v1376_v31 = vsel %vm677_vm13, 0.0, %v1375_v17  ;;  %v2437_v32 = vperm.slane %v1030_v21, %v2414_v3  ;;  %v1016_v59 = vperm.slane %v1008_v50, %v2355_v39 }
 0x174   : > { %v1032_v23 = vsel %vm677_vm13, %v1024_v5, %v1031_v13  ;;  %v729_v13 = vrot.slane %v720_v2, 4 }
 0x175   : > { %v1040_v27 = vperm.slane %v1032_v23, %v2414_v3 }
 0x176   : > { %v730_v14 = vsel %vm677_vm13, 0.0, %v729_v13 }
 0x177   : > { %v1055_v61 = vrot.slane %v1040_v27, 4 }
 0x178   : > { %903 = vrot.lane.b32.xlu2 %v2347_v34, %s1933_s30  ;;  %1107 = vrot.lane.b32.xlu0 %v2377_v6, %s1930_s29 }
 0x179   : > { %1425 = vrot.lane.b32.xlu1 %v1529_v44, %s1930_s29  ;;  %v1349_v44 = vrot.slane %v1344_v57, 4  ;;  %v1056_v0 = vsel %vm677_vm13, 0.0, %v1055_v61 }
 0x17b   : > { %v1350_v42 = vsel %vm677_vm13, %v1349_v44, %v1332_v24 }
 0x17c   : > { %v2460_v62 = vperm.slane %v1350_v42, %v2414_v3 }
 0x17e   : > { %v1373_v18 = vrot.slane %v2460_v62, 4 }
 0x180   : > { %1219 = vrot.lane.b32.xlu2 %v2377_v6, %s1933_s30  ;;  %1221 = vrot.lane.b32.xlu0 %v2367_v47, %s1933_s30  ;;  %v1374_v30 = vsel %vm677_vm13, 0.0, %v1373_v18 }
 0x181   : > { %901 = vrot.lane.b32.xlu1 %v891_v49, %s1933_s30 }
 0x188   : > { %791 = vrot.lane.b32.xlu2 %v2347_v34, %s1930_s29  ;;  %899 = vrot.lane.b32.xlu0 %v2345_v35, %s1933_s30  ;;  %v1020_v34 = vsel %vm677_vm13, %v2339_v29, %v1019_v40 }
 0x189   : > { %787 = vrot.lane.b32.xlu1 %v2345_v35, %s1930_s29  ;;  %v696_v35 = vperm.slane %v690_v26, %v2355_v39  ;;  %v1028_v53 = vperm.slane %v1020_v34, %v2355_v39 }
 0x18b   : > { %v704_v38 = vsel %vm677_vm13, %v696_v35, %v703_v28  ;;  %v1041_v47 = vrot.slane %v1028_v53, 4  ;;  %v701_v6 = vrot.slane %v696_v35, 4 }
 0x18c   : > { %v712_v43 = vperm.slane %v704_v38, %v2414_v3 }
 0x18d   : > { %v1042_v54 = vsel %vm677_vm13, %v1041_v47, %v1016_v59  ;;  %v702_v24 = vsel %vm677_vm13, %v701_v6, %v684_v20 }
 0x18e   : > { %v1048_v19 = vperm.slane %v1042_v54, %v2414_v3  ;;  %v2469_v37 = vperm.slane %v702_v24, %v2414_v3  ;;  %v727_v33 = vrot.slane %v712_v43, 4 }
 0x190   : > { %1105 = vrot.lane.b32.xlu2 %v1097_v55, %s1930_s29  ;;  %1217 = vrot.lane.b32.xlu0 %v1097_v55, %s1933_s30  ;;  %v1378_v55 = vsel %vm677_vm13, 0.0, %v1377_v52  ;;  %v725_v4 = vrot.slane %v2469_v37, 4  ;;  %v728_v9 = vsel %vm677_vm13, 0.0, %v727_v33  ;;  %v1057_v57 = vrot.slane %v1048_v19, 4 }
 0x191   : > { %785 = vrot.lane.b32.xlu1 %v2349_v36, %s1930_s29 }
 0x192   : > { %v726_v45 = vsel %vm677_vm13, 0.0, %v725_v4  ;;  %v1058_v63 = vsel %vm677_vm13, 0.0, %v1057_v57 }
 0x198   : > { %897 = vrot.lane.b32.xlu0 %v2349_v36, %s1933_s30  ;;  %789 = vrot.lane.b32.xlu2 %v891_v49, %s1930_s29  ;;  %v1053_v36 = vrot.slane %v2437_v32, 4  ;;  %v1364_v49 = vsel %vm677_vm13, %v1348_v8, %v1363_v60  ;;  %v1043_v8 = vrot.slane %v1016_v59, 4  ;;  %s164_s29 = scalar_lea.vmem [#allocation4], %s1800_s25 }
 0x199   : > { %1386 = vrot.lane.b32.xlu1 %v1360_v10, %s1936_s4  ;;  %v1372_v29 = vperm.slane %v1364_v49, %v2414_v3  ;;  %s1707_s30 = sshll.u32 %s164_s29, 4  ;;  %s1708_s30 = int_to_ptr.vmem [resolvable:$true] %s1707_s30 }
 0x19a   : > { %v1054_v58 = vsel %vm677_vm13, 0.0, %v1053_v36  ;;  %v1044_v12 = vsel %vm677_vm13, %v1028_v53, %v1043_v8 }
 0x19b   : > { %v1379_v56 = vrot.slane %v1372_v29, 4  ;;  %v2491_v11 = vperm.slane %v1044_v12, %v2414_v3 }
 0x19d   : > { %v1380_v7 = vsel %vm677_vm13, 0.0, %v1379_v56 }
 0x1a0   : > { %1390 = vrot.lane.b32.xlu0 %v1376_v31, %s1937_s5  ;;  %1394 = vrot.lane.b32.xlu2 %v1368_v25, %s1938_s6 }
 0x1a1   : > { %1066 = vrot.lane.b32.xlu1 %v1040_v27, %s1936_s4 }
 0x1a8   : > { %1062 = vrot.lane.b32.xlu0 %v1054_v58, %s1939_s7  ;;  %738 = vrot.lane.b32.xlu2 %v712_v43, %s1936_s4  ;;  %v1540_v10 = vpop.permute.xlu1 %1539 }
 0x1a9   : > { %1402 = vrot.lane.b32.xlu1 %v1372_v29, %s1940_s8  ;;  %v1563_v25 = vrot.slane %v1540_v10, 4 }
 0x1b0   : > { %1398 = vrot.lane.b32.xlu0 %v1378_v55, %s1941_s9  ;;  %1074 = vrot.lane.b32.xlu2 %v1048_v19, %s1938_s6 }
 0x1b1   : > { %1382 = vrot.lane.b32.xlu1 %v1374_v30, %s1939_s7 }
 0x1b8   : > { %742 = vrot.lane.b32.xlu2 %v728_v9, %s1937_s5  ;;  %734 = vrot.lane.b32.xlu0 %v726_v45, %s1939_s7 }
 0x1ba   : > { %v1544_v46 = vpop.permute.xlu2 %1543 }
 0x1bb   : > { %v1561_v17 = vrot.slane %v1544_v46, 4  ;;  %v1564_v40 = vsel %vm677_vm13, %v1544_v46, %v1563_v25 }
 0x1bc   : > { %v2515_v34 = vperm.slane %v1564_v40, %v2355_v39 }
 0x1bd   : > { %v1562_v26 = vsel %vm677_vm13, %v1561_v17, %v1540_v10 }
 0x1be   : > { %v2510_v60 = vperm.slane %v1562_v26, %v2355_v39  ;;  %v1585_v53 = vrot.slane %v2515_v34, 4 }
 0x1c0   : > { %1078 = vrot.lane.b32.xlu2 %v1058_v63, %s1941_s9  ;;  %1070 = vrot.lane.b32.xlu0 %v1056_v0, %s1937_s5 }
 0x1c2   : > { %v1542_v1 = vpop.permute.xlu2 %1541 }
 0x1c3   : > { %v1549_v22 = vrot.slane %v1542_v1, 4 }
 0x1c8   : > { %746 = vrot.lane.b32.xlu2 %v720_v2, %s1938_s6  ;;  %1406 = vrot.lane.b32.xlu0 %v1380_v7, %s1942_s10 }
 0x1ca   : > { %v1428_v5 = vpop.permute.xlu2 %1427 }
 0x1cb   : > { %v1451_v18 = vrot.slane %v1428_v5, 4 }
 0x1d0   : > { %1082 = vrot.lane.b32.xlu2 %v2491_v11, %s1940_s8  ;;  %750 = vrot.lane.b32.xlu0 %v730_v14, %s1941_s9 }
 0x1d2   : > { %v2497_v48 = vpop.permute.xlu2 %903  ;;  %v1432_v15 = vpop.permute.xlu0 %1431 }
 0x1d3   : > { %v2499_v16 = vpop.permute.xlu1 %1223  ;;  %v1449_v58 = vrot.slane %v1432_v15, 4  ;;  %v1452_v61 = vsel %vm677_vm13, %v1432_v15, %v1451_v18 }
 0x1d4   : > { %v1460_v10 = vperm.slane %v1452_v61, %v2355_v39  ;;  %v921_v61 = vrot.slane %v2497_v48, 4 }
 0x1d5   : > { %v1450_v33 = vsel %vm677_vm13, %v1449_v58, %v1428_v5 }
 0x1d6   : > { %v1456_v56 = vperm.slane %v1450_v33, %v2355_v39  ;;  %v1473_v26 = vrot.slane %v1460_v10, 4 }
 0x1da   : > { %v2501_v20 = vpop.permute.xlu2 %1219  ;;  %v1112_v23 = vpop.permute.xlu0 %1111 }
 0x1db   : > { %v1538_v21 = vpop.permute.xlu1 %1537  ;;  %v1129_v29 = vrot.slane %v1112_v23, 4 }
 0x1dc   : > { %v1550_v31 = vsel %vm677_vm13, %v1549_v22, %v1538_v21  ;;  %v1551_v27 = vrot.slane %v1538_v21, 4 }
 0x1dd   : > { %v2506_v28 = vperm.slane %v1550_v31, %v2355_v39 }
 0x1de   : > { %v1552_v41 = vsel %vm677_vm13, %v1542_v1, %v1551_v27 }
 0x1df   : > { %v1575_v35 = vrot.slane %v2506_v28, 4  ;;  %v2525_v50 = vperm.slane %v1552_v41, %v2355_v39 }
 0x1e1   : > { %v1576_v36 = vsel %vm677_vm13, %v2510_v60, %v1575_v35  ;;  %v1586_v43 = vsel %vm677_vm13, %v1585_v53, %v2525_v50 }
 0x1e2   : > { %v2519_v38 = vpop.permute.xlu2 %791  ;;  %v1430_v44 = vpop.permute.xlu0 %1429  ;;  %v2522_v49 = vperm.slane %v1576_v36, %v2414_v3  ;;  %v2533_v54 = vperm.slane %v1586_v43, %v2414_v3  ;;  %v1573_v43 = vrot.slane %v2510_v60, 4 }
 0x1e3   : > { %v1110_v42 = vpop.permute.xlu1 %1109  ;;  %v1437_v47 = vrot.slane %v1430_v44, 4 }
 0x1e4   : > { %1610 = vrot.lane.b32.xlu0 %v2522_v49, %s1936_s4  ;;  %v1117_v59 = vrot.slane %v1110_v42, 4 }
 0x1ea   : > { %v1106_v6 = vpop.permute.xlu2 %1105  ;;  %v1108_v52 = vpop.permute.xlu0 %1107 }
 0x1eb   : > { %v1118_v24 = vsel %vm677_vm13, %v1117_v59, %v1106_v6  ;;  %v1426_v19 = vpop.permute.xlu1 %1425  ;;  %v1130_v55 = vsel %vm677_vm13, %v1129_v29, %v1108_v52  ;;  %v1131_v30 = vrot.slane %v1108_v52, 4  ;;  %v1119_v63 = vrot.slane %v1106_v6, 4 }
 0x1ec   : > { %v2539_v4 = vperm.slane %v1118_v24, %v2355_v39  ;;  %v1438_v9 = vsel %vm677_vm13, %v1437_v47, %v1426_v19  ;;  %v1439_v45 = vrot.slane %v1426_v19, 4  ;;  %1618 = vrot.lane.b32.xlu0 %v2533_v54, %s1938_s6  ;;  %v2549_v1 = vperm.slane %v1130_v55, %v2355_v39 }
 0x1ed   : > { %v1444_v46 = vperm.slane %v1438_v9, %v2355_v39  ;;  %v1132_v57 = vsel %vm677_vm13, %v1112_v23, %v1131_v30  ;;  %v1120_v14 = vsel %vm677_vm13, %v1110_v42, %v1119_v63  ;;  %v1574_v29 = vsel %vm677_vm13, %v1573_v43, %v2506_v28 }
 0x1ee   : > { %v1143_v0 = vrot.slane %v2539_v4, 4  ;;  %v2553_v7 = vperm.slane %v1132_v57, %v2355_v39  ;;  %v1440_v8 = vsel %vm677_vm13, %v1430_v44, %v1439_v45  ;;  %v2578_v31 = vperm.slane %v1120_v14, %v2355_v39 }
 0x1ef   : > { %v1463_v2 = vrot.slane %v1444_v46, 4  ;;  %v1448_v23 = vperm.slane %v1440_v8, %v2355_v39  ;;  %v1241_v59 = vrot.slane %v2499_v16, 4  ;;  %v2607_v18 = vperm.slane %v1574_v29, %v2414_v3 }
 0x1f0   : > { %v1144_v5 = vsel %vm677_vm13, %v2549_v1, %v1143_v0  ;;  %v1153_v21 = vrot.slane %v2553_v7, 4  ;;  %v1461_v30 = vrot.slane %v1456_v56, 4  ;;  %v1243_v0 = vrot.slane %v2501_v20, 4 }
 0x1f1   : > { %v1464_v12 = vsel %vm677_vm13, %v1456_v56, %v1463_v2  ;;  %v2561_v13 = vperm.slane %v1144_v5, %v2414_v3  ;;  %v1474_v40 = vsel %vm677_vm13, %v1473_v26, %v1448_v23  ;;  %v1475_v42 = vrot.slane %v1448_v23, 4 }
 0x1f2   : > { %v2564_v15 = vpop.permute.xlu2 %789  ;;  %v2566_v17 = vpop.permute.xlu0 %1221  ;;  %v2569_v22 = vperm.slane %v1464_v12, %v2414_v3  ;;  %v1154_v27 = vsel %vm677_vm13, %v1153_v21, %v2578_v31  ;;  %v2589_v44 = vperm.slane %v1474_v40, %v2414_v3  ;;  %v1242_v24 = vsel %vm677_vm13, %v1241_v59, %v2501_v20 }
 0x1f3   : > { %v902_v25 = vpop.permute.xlu1 %901  ;;  %v2586_v36 = vperm.slane %v1154_v27, %v2414_v3  ;;  %v1476_v58 = vsel %vm677_vm13, %v1460_v10, %v1475_v42  ;;  %v1229_v47 = vrot.slane %v2566_v17, 4  ;;  %v1248_v33 = vperm.slane %v1242_v24, %v2355_v39 }
 0x1f4   : > { %1498 = vrot.lane.b32.xlu2 %v2569_v22, %s1936_s4  ;;  %1178 = vrot.lane.b32.xlu0 %v2561_v13, %s1936_s4  ;;  %v2604_v52 = vperm.slane %v1476_v58, %v2414_v3  ;;  %v1597_v45 = vrot.slane %v2607_v18, 4  ;;  %v1462_v57 = vsel %vm677_vm13, %v1461_v30, %v1444_v46  ;;  %v909_v2 = vrot.slane %v902_v25, 4 }
 0x1f5   : > { %v1587_v56 = vrot.slane %v2525_v50, 4  ;;  %v2631_v14 = vperm.slane %v1462_v57, %v2414_v3  ;;  %v1244_v50 = vsel %vm677_vm13, %v2499_v16, %v1243_v0  ;;  %v1253_v42 = vrot.slane %v1248_v33, 4 }
 0x1f6   : > { %v1598_v12 = vsel %vm677_vm13, 0.0, %v1597_v45  ;;  %v1252_v16 = vperm.slane %v1244_v50, %v2355_v39  ;;  %v797_v30 = vrot.slane %v2564_v15, 4 }
 0x1f7   : > { %v1588_v29 = vsel %vm677_vm13, %v2515_v34, %v1587_v56 }
 0x1fa   : > { %v2583_v35 = vpop.permute.xlu2 %1394  ;;  %v900_v41 = vpop.permute.xlu0 %899 }
 0x1fb   : > { %v2591_v53 = vpop.permute.xlu1 %787  ;;  %v923_v8 = vrot.slane %v900_v41, 4  ;;  %v922_v46 = vsel %vm677_vm13, %v921_v61, %v900_v41  ;;  %v1265_v61 = vrot.slane %v1252_v16, 4 }
 0x1fc   : > { %1186 = vrot.lane.b32.xlu2 %v2586_v36, %s1938_s6  ;;  %1506 = vrot.lane.b32.xlu0 %v2589_v44, %s1938_s6  ;;  %v928_v43 = vperm.slane %v922_v46, %v2355_v39 }
 0x1fd   : > { %v924_v40 = vsel %vm677_vm13, %v2497_v48, %v923_v8 }
 0x1fe   : > { %v932_v48 = vperm.slane %v924_v40, %v2355_v39 }
 0x202   : > { %v1218_v6 = vpop.permute.xlu0 %1217  ;;  %v2613_v19 = vpop.permute.xlu2 %738 }
 0x203   : > { %v2611_v60 = vpop.permute.xlu1 %785  ;;  %v1230_v28 = vsel %vm677_vm13, %v1229_v47, %v1218_v6  ;;  %v1231_v23 = vrot.slane %v1218_v6, 4  ;;  %v1485_v6 = vrot.slane %v2631_v14, 4 }
 0x204   : > { %v1236_v55 = vperm.slane %v1230_v28, %v2355_v39  ;;  %1514 = vrot.lane.b32.xlu2 %v2604_v52, %s1940_s8  ;;  %v798_v45 = vsel %vm677_vm13, %v797_v30, %v2611_v60  ;;  %v1601_v30 = vrot.slane %v2533_v54, 4 }
 0x205   : > { %v1232_v59 = vsel %vm677_vm13, %v2566_v17, %v1231_v23  ;;  %v1486_v57 = vsel %vm677_vm13, 0.0, %v1485_v6  ;;  %v933_v6 = vrot.slane %v928_v43, 4 }
 0x206   : > { %v1255_v9 = vrot.slane %v1236_v55, 4  ;;  %v1254_v28 = vsel %vm677_vm13, %v1253_v42, %v1236_v55  ;;  %v1240_v17 = vperm.slane %v1232_v59, %v2355_v39  ;;  %v1602_v54 = vsel %vm677_vm13, 0.0, %v1601_v30 }
 0x207   : > { %v2677_v55 = vperm.slane %v1254_v28, %v2414_v3 }
 0x208   : > { %v1256_v63 = vsel %vm677_vm13, %v1248_v33, %v1255_v9  ;;  %v2660_v33 = vperm.slane %v1588_v29, %v2414_v3  ;;  %v1266_v56 = vsel %vm677_vm13, %v1265_v61, %v1240_v17  ;;  %v1267_v40 = vrot.slane %v1240_v17, 4 }
 0x209   : > { %v2626_v5 = vperm.slane %v1256_v63, %v2414_v3  ;;  %v945_v63 = vrot.slane %v932_v48, 4  ;;  %v1277_v46 = vrot.slane %v2677_v55, 4 }
 0x20a   : > { %v898_v10 = vpop.permute.xlu0 %897  ;;  %v2645_v41 = vpop.permute.xlu2 %1074 }
 0x20b   : > { %v2634_v21 = vpop.permute.xlu1 %1386  ;;  %v910_v20 = vsel %vm677_vm13, %v909_v2, %v898_v10  ;;  %v911_v26 = vrot.slane %v898_v10, 4  ;;  %1290 = vrot.lane.b32.xlu1 %v2626_v5, %s1936_s4  ;;  %v2681_v2 = vperm.slane %v798_v45, %v2355_v39  ;;  %v809_v10 = vrot.slane %v2519_v38, 4 }
 0x20c   : > { %v916_v27 = vperm.slane %v910_v20, %v2355_v39  ;;  %1606 = vrot.lane.b32.xlu2 %v1598_v12, %s1939_s7  ;;  %v1278_v29 = vsel %vm677_vm13, 0.0, %v1277_v46  ;;  %v811_v45 = vrot.slane %v2591_v53, 4  ;;  %v1279_v30 = vrot.slane %v2626_v5, 4 }
 0x20d   : > { %v912_v47 = vsel %vm677_vm13, %v902_v25, %v911_v26  ;;  %v810_v23 = vsel %vm677_vm13, %v809_v10, %v2591_v53  ;;  %v2693_v26 = vperm.slane %v1266_v56, %v2414_v3  ;;  %v823_v50 = vrot.slane %v2681_v2, 4 }
 0x20e   : > { %v935_v58 = vrot.slane %v916_v27, 4  ;;  %v920_v25 = vperm.slane %v912_v47, %v2355_v39  ;;  %v2704_v59 = vperm.slane %v810_v23, %v2355_v39  ;;  %v934_v17 = vsel %vm677_vm13, %v933_v6, %v916_v27 }
 0x20f   : > { %v799_v56 = vrot.slane %v2611_v60, 4  ;;  %v2731_v53 = vperm.slane %v934_v17, %v2414_v3 }
 0x210   : > { %v936_v24 = vsel %vm677_vm13, %v928_v43, %v935_v58  ;;  %v946_v8 = vsel %vm677_vm13, %v945_v63, %v920_v25  ;;  %v824_v28 = vsel %vm677_vm13, %v2704_v59, %v823_v50  ;;  %v1155_v43 = vrot.slane %v2578_v31, 4 }
 0x211   : > { %v2663_v34 = vperm.slane %v936_v24, %v2414_v3  ;;  %v2690_v20 = vperm.slane %v946_v8, %v2414_v3  ;;  %v2720_v63 = vperm.slane %v824_v28, %v2414_v3  ;;  %v1141_v8 = vrot.slane %v2549_v1, 4 }
 0x212   : > { %v2667_v9 = vpop.permute.xlu0 %1390  ;;  %v743_v12 = vpop.permute.xlu2 %742  ;;  %v812_v31 = vsel %vm677_vm13, %v2519_v38, %v811_v45  ;;  %v1156_v60 = vsel %vm677_vm13, %v2553_v7, %v1155_v43  ;;  %v800_v27 = vsel %vm677_vm13, %v2564_v15, %v799_v56  ;;  %v1280_v43 = vsel %vm677_vm13, 0.0, %v1279_v30 }
 0x213   : > { %1626 = vrot.lane.b32.xlu1 %v2660_v33, %s1940_s8  ;;  %970 = vrot.lane.b32.xlu0 %v2663_v34, %s1936_s4  ;;  %v1067_v0 = vpop.permute.xlu1 %1066  ;;  %v1142_v10 = vsel %vm677_vm13, %v1141_v8, %v2539_v4  ;;  %v2745_v46 = vperm.slane %v812_v31, %v2355_v39  ;;  %v2751_v38 = vperm.slane %v1156_v60, %v2414_v3  ;;  %v1487_v8 = vrot.slane %v2569_v22, 4 }
 0x214   : > { %1494 = vrot.lane.b32.xlu2 %v1486_v57, %s1939_s7  ;;  %v2754_v7 = vperm.slane %v800_v27, %v2355_v39  ;;  %v2757_v15 = vperm.slane %v1142_v10, %v2414_v3  ;;  %v1599_v56 = vrot.slane %v2522_v49, 4 }
 0x215   : > { %v1488_v60 = vsel %vm677_vm13, 0.0, %v1487_v8 }
 0x216   : > { %v1165_v6 = vrot.slane %v2757_v15, 4 }
 0x21a   : > { %v1063_v42 = vpop.permute.xlu0 %1062  ;;  %v1079_v57 = vpop.permute.xlu2 %1078 }
 0x21b   : > { %v1089_v58 = vsel %vm761_vm14, %v2437_v32, %v1063_v42  ;;  %978 = vrot.lane.b32.xlu1 %v2690_v20, %s1938_s6  ;;  %1298 = vrot.lane.b32.xlu0 %v2693_v26, %s1938_s6  ;;  %v2708_v24 = vpop.permute.xlu1 %1402  ;;  %v1268_v32 = vsel %vm677_vm13, %v1252_v16, %v1267_v40 }
 0x21c   : > { %1286 = vrot.lane.b32.xlu2 %v1278_v29, %s1939_s7  ;;  %v1090_v47 = vsel %vm763_vm15, %v1089_v58, %v1067_v0  ;;  %v2717_v61 = vperm.slane %v1268_v32, %v2414_v3  ;;  %v947_v0 = vrot.slane %v920_v25, 4  ;;  %v957_v25 = vrot.slane %v2731_v53, 4 }
 0x21d   : > { %v833_v58 = vrot.slane %v2745_v46, 4 }
 0x21e   : > { %v948_v1 = vsel %vm677_vm13, %v932_v48, %v947_v0  ;;  %v958_v39 = vsel %vm677_vm13, 0.0, %v957_v25 }
 0x21f   : > { %v2748_v50 = vperm.slane %v948_v1, %v2414_v3  ;;  %v834_v32 = vsel %vm677_vm13, %v833_v58, %v2754_v7 }
 0x220   : > { %v2783_v17 = vperm.slane %v834_v32, %v2414_v3 }
 0x222   : > { %v1399_v16 = vpop.permute.xlu0 %1398  ;;  %v747_v40 = vpop.permute.xlu2 %746 }
 0x223   : > { %1306 = vrot.lane.b32.xlu1 %v2717_v61, %s1940_s8  ;;  %858 = vrot.lane.b32.xlu0 %v2720_v63, %s1936_s4  ;;  %v1383_v23 = vpop.permute.xlu1 %1382  ;;  %s1709_s4 = sshll.u32 %s1705_s28, 4  ;;  %s1710_s4 = int_to_ptr.hbm [resolvable:$true] %s1709_s4 }
 0x224   : > { %1622 = vrot.lane.b32.xlu2 %v1602_v54, %s1941_s9  ;;  %v1409_v4 = vsel %vm761_vm14, %v2460_v62, %v1383_v23 }
 0x22a   : > { %v735_v48 = vpop.permute.xlu0 %734  ;;  %v1083_v0 = vpop.permute.xlu2 %1082 }
 0x22b   : > { %v762_v42 = vsel %vm761_vm14, %v2469_v37, %v735_v48  ;;  %986 = vrot.lane.b32.xlu1 %v2748_v50, %s1940_s8  ;;  %1194 = vrot.lane.b32.xlu0 %v2751_v38, %s1940_s8  ;;  %v1410_v37 = vsel %vm763_vm15, %v1409_v4, %v2634_v21  ;;  %v1281_v4 = vrot.slane %v2693_v26, 4 }
 0x22c   : > { %v764_v29 = vsel %vm763_vm15, %v762_v42, %v2613_v19  ;;  %966 = vrot.lane.b32.xlu2 %v958_v39, %s1939_s7  ;;  %v1411_v19 = vsel %vm765_vm0, %v1410_v37, %v2667_v9  ;;  %v724_v37 = vperm.slane %v2375_v51, %v2414_v3 }
 0x22d   : > { %v766_v62 = vsel %vm765_vm0, %v764_v29, %v743_v12  ;;  %v1166_v12 = vsel %vm677_vm13, 0.0, %v1165_v6  ;;  %v1412_v5 = vsel %vm767_vm2, %v1411_v19, %v2583_v35  ;;  %v1603_v35 = vrot.slane %v2660_v33, 4 }
 0x22e   : > { %v768_v28 = vsel %vm767_vm2, %v766_v62, %v747_v40  ;;  %v1413_v31 = vsel %vm769_vm3, %v1412_v5, %v1399_v16  ;;  %v1167_v33 = vrot.slane %v2561_v13, 4  ;;  %v959_v16 = vrot.slane %v2663_v34, 4 }
 0x22f   : > { %v1604_v49 = vsel %vm677_vm13, 0.0, %v1603_v35  ;;  %v821_v13 = vrot.slane %v2704_v59, 4  ;;  %v1489_v34 = vrot.slane %v2589_v44, 4  ;;  %v1282_v44 = vsel %vm677_vm13, 0.0, %v1281_v4 }
 0x230   : > { %v1168_v25 = vsel %vm677_vm13, 0.0, %v1167_v33  ;;  %v960_v48 = vsel %vm677_vm13, 0.0, %v959_v16  ;;  %v835_v6 = vrot.slane %v2754_v7, 4 }
 0x231   : > { %v822_v40 = vsel %vm677_vm13, %v821_v13, %v2681_v2  ;;  %v1490_v42 = vsel %vm677_vm13, 0.0, %v1489_v34  ;;  %v1059_v2 = vrot.slane %v2491_v11, 4 }
 0x232   : > { %v1071_v45 = vpop.permute.xlu0 %1070  ;;  %v2835_v58 = vperm.slane %v822_v40, %v2414_v3  ;;  %v836_v30 = vsel %vm677_vm13, %v2745_v46, %v835_v6 }
 0x233   : > { %v1091_v21 = vsel %vm765_vm0, %v1090_v47, %v1071_v45  ;;  %1174 = vrot.lane.b32.xlu1 %v1166_v12, %s1939_s7  ;;  %866 = vrot.lane.b32.xlu0 %v2783_v17, %s1938_s6  ;;  %v1060_v62 = vsel %vm677_vm13, 0.0, %v1059_v2  ;;  %v844_v19 = vperm.slane %v836_v30, %v2414_v3 }
 0x234   : > { %v1092_v9 = vsel %vm767_vm2, %v1091_v21, %v2645_v41  ;;  %1294 = vrot.lane.b32.xlu2 %v1280_v43, %s1937_s5  ;;  %v1414_v41 = vsel %vm771_vm4, %v1413_v31, %v2708_v24  ;;  %v847_v24 = vrot.slane %v2720_v63, 4  ;;  %v1171_v63 = vrot.slane %v2751_v38, 4 }
 0x235   : > { %v1093_v47 = vsel %vm769_vm3, %v1092_v9, %v1079_v57  ;;  %v1600_v57 = vsel %vm677_vm13, 0.0, %v1599_v56  ;;  %v845_v26 = vrot.slane %v2835_v58, 4  ;;  %v963_v38 = vrot.slane %v2748_v50, 4 }
 0x236   : > { %v2800_v54 = vsel %vm771_vm4, %v1093_v47, %v1083_v0  ;;  %v848_v10 = vsel %vm677_vm13, 0.0, %v847_v24  ;;  %v1172_v39 = vsel %vm677_vm13, 0.0, %v1171_v63  ;;  %v1169_v50 = vrot.slane %v2586_v36, 4 }
 0x237   : > { %v846_v29 = vsel %vm677_vm13, 0.0, %v845_v26  ;;  %v964_v32 = vsel %vm677_vm13, 0.0, %v963_v38  ;;  %v1491_v36 = vrot.slane %v2604_v52, 4  ;;  %v961_v43 = vrot.slane %v2690_v20, 4 }
 0x238   : > { %v1170_v51 = vsel %vm677_vm13, 0.0, %v1169_v50  ;;  %v1283_v0 = vrot.slane %v2717_v61, 4  ;;  %v849_v31 = vrot.slane %v2783_v17, 4  ;;  %v851_v33 = vrot.slane %v844_v19, 4 }
 0x239   : > { %v1492_v21 = vsel %vm677_vm13, 0.0, %v1491_v36  ;;  %v962_v3 = vsel %vm677_vm13, 0.0, %v961_v43 }
 0x23a   : > { %v1407_v1 = vpop.permute.xlu0 %1406  ;;  %v1284_v8 = vsel %vm677_vm13, 0.0, %v1283_v0  ;;  %v850_v35 = vsel %vm677_vm13, 0.0, %v849_v31  ;;  %v852_v17 = vsel %vm677_vm13, 0.0, %v851_v33 }
 0x23b   : > { %v1415_v22 = vsel %vm773_vm5, %v1414_v41, %v1407_v1  ;;  %1502 = vrot.lane.b32.xlu1 %v1488_v60, %s1937_s5  ;;  %1614 = vrot.lane.b32.xlu0 %v1600_v57, %s1937_s5 }
 0x23c   : > { %1416 = vst.msk [vmem:[#allocation3 + $0x18] sm:$0xf] %vm775_vm6, %v1415_v22  ;;  %1630 = vrot.lane.b32.xlu2 %v1604_v49, %s1942_s10 }
 0x242   : > { %v751_v27 = vpop.permute.xlu0 %750 }
 0x243   : > { %v2820_v23 = vsel %vm769_vm3, %v768_v28, %v751_v27  ;;  %1182 = vrot.lane.b32.xlu1 %v1168_v25, %s1937_s5  ;;  %862 = vrot.lane.b32.xlu0 %v848_v10, %s1937_s5  ;;  %v731_v28 = vrot.slane %v724_v37, 4 }
 0x244   : > { %974 = vrot.lane.b32.xlu2 %v960_v48, %s1937_s5  ;;  %s1880_s5 = sshra.s32 %s1710_s4, 4  ;;  %s1881_s5 = int_to_ptr.hbm [resolvable:$true] %s1880_s5 }
 0x245   : > { %v732_v7 = vsel %vm677_vm13, 0.0, %v731_v28  ;;  %s1882_s6 = scalar_lea.hbm %s1881_s5, 4  ;;  %p1887_p0 = scmp.lt.s32.totalorder %s1881_s5, %s2990_s2 }
 0x246   : > { %p1883_p11 = scmp.ne.s32.totalorder %s1881_s5, %s1882_s6 }
 0x248   : > { %p1884_p12 = pnand %p1883_p11, %p2001_p5 }
 0x24a   : > { %p1885_p13 = pneg %p1884_p12 }
 0x24b   : > { %1510 = vrot.lane.b32.xlu1 %v1490_v42, %s1941_s9  ;;  %1198 = vrot.lane.b32.xlu0 %v1172_v39, %s1942_s10 }
 0x24c   : > { %1302 = vrot.lane.b32.xlu2 %v1282_v44, %s1941_s9 }
 0x24e   : > { %v1499_v59 = vpop.permute.xlu2 %1498 }
 0x253   : > { %854 = vrot.lane.b32.xlu1 %v846_v29, %s1939_s7  ;;  %1086 = vrot.lane.b32.xlu0 %v1060_v62, %s1942_s10 }
 0x254   : > { %990 = vrot.lane.b32.xlu2 %v964_v32, %s1942_s10 }
 0x256   : > { %v2853_v11 = vpop.permute.xlu2 %1186  ;;  %v1611_v12 = vpop.permute.xlu0 %1610 }
 0x25b   : > { %1190 = vrot.lane.b32.xlu1 %v1170_v51, %s1941_s9  ;;  %758 = vrot.lane.b32.xlu0 %v732_v7, %s1942_s10 }
 0x25c   : > { %874 = vrot.lane.b32.xlu2 %v844_v19, %s1940_s8 }
 0x25e   : > { %v2864_v45 = vpop.permute.xlu2 %1514  ;;  %v1619_v5 = vpop.permute.xlu0 %1618 }
 0x263   : > { %1518 = vrot.lane.b32.xlu1 %v1492_v21, %s1942_s10 }
 0x266   : > { %v1607_v46 = vpop.permute.xlu2 %1606  ;;  %v2877_v56 = vpop.permute.xlu0 %1178 }
 0x267   : > { %v1633_v62 = vsel %vm761_vm14, %v2607_v18, %v1607_v46 }
 0x26b   : > { %982 = vrot.lane.b32.xlu1 %v962_v3, %s1941_s9 }
 0x26e   : > { %v1495_v9 = vpop.permute.xlu2 %1494  ;;  %v1507_v41 = vpop.permute.xlu0 %1506 }
 0x26f   : > { %v1521_v47 = vsel %vm761_vm14, %v2631_v14, %v1495_v9 }
 0x270   : > { %v1522_v52 = vsel %vm763_vm15, %v1521_v47, %v1499_v59 }
 0x273   : > { %1310 = vrot.lane.b32.xlu1 %v1284_v8, %s1942_s10 }
 0x276   : > { %v1287_v20 = vpop.permute.xlu2 %1286 }
 0x277   : > { %v1313_v61 = vsel %vm761_vm14, %v2677_v55, %v1287_v20 }
 0x27b   : > { %870 = vrot.lane.b32.xlu1 %v850_v35, %s1941_s9  ;;  %s1886_s9 = scalar_lea.hbm %s2990_s2, 8 }
 0x27c   : > { %p1888_p1 = scmp.lt.s32.totalorder %s1886_s9, %s1882_s6 }
 0x27d   : > { %v1291_v14 = vpop.permute.xlu1 %1290 }
 0x27e   : > { %v1314_v1 = vsel %vm763_vm15, %v1313_v61, %v1291_v14  ;;  %v1623_v60 = vpop.permute.xlu2 %1622  ;;  %p1889_p2 = por %p1888_p1, %p1887_p0 }
 0x280   : > { %p1890_p3 = pnand %p1889_p2, %p1885_p13 }
 0x283   : > { %754 = vrot.lane.b32.xlu1 %v724_v37, %s1940_s8  ;;  %v1634_v37 = vsel %vm763_vm15, %v1633_v62, %v1611_v12 }
 0x285   : > { %v1627_v57 = vpop.permute.xlu1 %1626  ;;  %v971_v22 = vpop.permute.xlu0 %970 }
 0x286   : > { %v967_v49 = vpop.permute.xlu2 %966 }
 0x287   : > { %v993_v34 = vsel %vm761_vm14, %v2731_v53, %v967_v49 }
 0x288   : > { %v994_v40 = vsel %vm763_vm15, %v993_v34, %v971_v22 }
 0x28b   : > { %878 = vrot.lane.b32.xlu1 %v852_v17, %s1942_s10 }
 0x28d   : > { %v979_v24 = vpop.permute.xlu1 %978  ;;  %v1299_v16 = vpop.permute.xlu0 %1298 }
 0x28e   : > { %v1295_v27 = vpop.permute.xlu2 %1294 }
 0x28f   : > { %v1315_v25 = vsel %vm765_vm0, %v1314_v1, %v1295_v27 }
 0x290   : > { %v1316_v55 = vsel %vm767_vm2, %v1315_v25, %v1299_v16 }
 0x295   : > { %v1307_v10 = vpop.permute.xlu1 %1306  ;;  %v859_v48 = vpop.permute.xlu0 %858 }
 0x296   : > { %v1631_v13 = vpop.permute.xlu2 %1630 }
 0x29d   : > { %v987_v63 = vpop.permute.xlu1 %986  ;;  %v1195_v4 = vpop.permute.xlu0 %1194 }
 0x29e   : > { %v975_v42 = vpop.permute.xlu2 %974 }
 0x29f   : > { %v995_v39 = vsel %vm765_vm0, %v994_v40, %v975_v42  ;;  %v1641_v42 = vld [vmem:[%s2989_s1] sm:$0xff] }
 0x2a0   : > { %v996_v44 = vsel %vm767_vm2, %v995_v39, %v979_v24 }
 0x2a5   : > { %v1175_v59 = vpop.permute.xlu1 %1174  ;;  %v867_v26 = vpop.permute.xlu0 %866 }
 0x2a6   : > { %v1303_v2 = vpop.permute.xlu2 %1302 }
 0x2a7   : > { %v1317_v38 = vsel %vm769_vm3, %v1316_v55, %v1303_v2 }
 0x2a8   : > { %v1318_v29 = vsel %vm771_vm4, %v1317_v38, %v1307_v10 }
 0x2ad   : > { %v1503_v53 = vpop.permute.xlu1 %1502  ;;  %v1615_v6 = vpop.permute.xlu0 %1614 }
 0x2ae   : > { %v1523_v32 = vsel %vm765_vm0, %v1522_v52, %v1503_v53  ;;  %v1635_v50 = vsel %vm765_vm0, %v1634_v37, %v1615_v6  ;;  %v991_v22 = vpop.permute.xlu2 %990 }
 0x2af   : > { %v1636_v28 = vsel %vm767_vm2, %v1635_v50, %v1619_v5  ;;  %v1524_v30 = vsel %vm767_vm2, %v1523_v32, %v1507_v41  ;;  %v1201_v5 = vsel %vm761_vm14, %v2757_v15, %v1175_v59 }
 0x2b0   : > { %v1637_v51 = vsel %vm769_vm3, %v1636_v28, %v1623_v60  ;;  %v1202_v8 = vsel %vm763_vm15, %v1201_v5, %v2877_v56 }
 0x2b1   : > { %v1638_v7 = vsel %vm771_vm4, %v1637_v51, %v1627_v57 }
 0x2b2   : > { %v1639_v19 = vsel %vm773_vm5, %v1638_v7, %v1631_v13 }
 0x2b3   : > { %1640 = vst.msk [vmem:[#allocation3 + $0x20] sm:$0xf] %vm775_vm6, %v1639_v19 }
 0x2b5   : > { %v1183_v18 = vpop.permute.xlu1 %1182  ;;  %v863_v36 = vpop.permute.xlu0 %862 }
 0x2b6   : > { %v1203_v31 = vsel %vm765_vm0, %v1202_v8, %v1183_v18  ;;  %v875_v34 = vpop.permute.xlu2 %874 }
 0x2ba   : > { %v1646_v12 = vld [vmem:[#allocation3 + $0x20] sm:$0xf] }
 0x2bb   : > { %1804 = vmatpush.msk.msra.mxu0 %vm1651_vm7, %v1646_v12 }
 0x2bd   : > { %v1511_v21 = vpop.permute.xlu1 %1510  ;;  %v1199_v46 = vpop.permute.xlu0 %1198 }
 0x2be   : > { %v1525_v61 = vsel %vm769_vm3, %v1524_v30, %v1511_v21 }
 0x2bf   : > { %v1526_v56 = vsel %vm771_vm4, %v1525_v61, %v2864_v45 }
 0x2c5   : > { %v855_v43 = vpop.permute.xlu1 %854  ;;  %v1087_v3 = vpop.permute.xlu0 %1086 }
 0x2c6   : > { %v881_v9 = vsel %vm761_vm14, %v2835_v58, %v855_v43  ;;  %v1095_v0 = vsel %vm773_vm5, %v2800_v54, %v1087_v3  ;;  %v1204_v58 = vsel %vm767_vm2, %v1203_v31, %v2853_v11 }
 0x2c7   : > { %v882_v47 = vsel %vm763_vm15, %v881_v9, %v859_v48  ;;  %1096 = vst.msk [vmem:[#allocation3 + $0xc] sm:$0xf] %vm775_vm6, %v1095_v0 }
 0x2c8   : > { %v883_v52 = vsel %vm765_vm0, %v882_v47, %v863_v36 }
 0x2c9   : > { %v884_v20 = vsel %vm767_vm2, %v883_v52, %v867_v26 }
 0x2cd   : > { %v1191_v15 = vpop.permute.xlu1 %1190  ;;  %v759_v55 = vpop.permute.xlu0 %758 }
 0x2ce   : > { %v1205_v35 = vsel %vm769_vm3, %v1204_v58, %v1191_v15 }
 0x2cf   : > { %v1206_v54 = vsel %vm771_vm4, %v1205_v35, %v1195_v4 }
 0x2d0   : > { %v1207_v41 = vsel %vm773_vm5, %v1206_v54, %v1199_v46 }
 0x2d1   : > { %1208 = vst.msk [vmem:[#allocation3 + $0x10] sm:$0xf] %vm775_vm6, %v1207_v41 }
 0x2d5   : > { %v1519_v14 = vpop.permute.xlu1 %1518 }
 0x2d6   : > { %v1527_v1 = vsel %vm773_vm5, %v1526_v56, %v1519_v14 }
 0x2d7   : > { %1528 = vst.msk [vmem:[#allocation3 + $0x1c] sm:$0xf] %vm775_vm6, %v1527_v1 }
 0x2dd   : > { %v983_v60 = vpop.permute.xlu1 %982 }
 0x2de   : > { %v997_v11 = vsel %vm769_vm3, %v996_v44, %v983_v60  ;;  %v1645_v57 = vld [vmem:[#allocation3 + $0x18] sm:$0xff] }
 0x2df   : > { %v998_v49 = vsel %vm771_vm4, %v997_v11, %v987_v63  ;;  %1667 = vmatpush.msra.mxu0 %v1645_v57 }
 0x2e0   : > { %v999_v33 = vsel %vm773_vm5, %v998_v49, %v991_v22 }
 0x2e1   : > { %1000 = vst.msk [vmem:[#allocation3 + $0x8] sm:$0xf] %vm775_vm6, %v999_v33 }
 0x2e5   : > { %v1311_v17 = vpop.permute.xlu1 %1310 }
 0x2e6   : > { %v1319_v24 = vsel %vm773_vm5, %v1318_v29, %v1311_v17 }
 0x2e7   : > { %1320 = vst.msk [vmem:[#allocation3 + $0x14] sm:$0xf] %vm775_vm6, %v1319_v24 }
 0x2e8   : > { %v1643_v27 = vld [vmem:[#allocation3 + $0x8] sm:$0xff] }
 0x2ed   : > { %v871_v45 = vpop.permute.xlu1 %870 }
 0x2ee   : > { %v1644_v16 = vld [vmem:[#allocation3 + $0x10] sm:$0xff]  ;;  %v885_v13 = vsel %vm769_vm3, %v884_v20, %v871_v45 }
 0x2ef   : > { %1668 = vmatpush.msra.mxu0 %v1644_v16  ;;  %v886_v4 = vsel %vm771_vm4, %v885_v13, %v875_v34 }
 0x2f1   : > { %1669 = vmatpush.msra.mxu0 %v1643_v27 }
 0x2f5   : > { %v755_v25 = vpop.permute.xlu1 %754 }
 0x2f6   : > { %v772_v10 = vsel %vm771_vm4, %v2820_v23, %v755_v25 }
 0x2f7   : > { %v774_v48 = vsel %vm773_vm5, %v772_v10, %v759_v55 }
 0x2f8   : > { %776 = vst.msk [vmem:[#allocation3] sm:$0xf] %vm775_vm6, %v774_v48 }
 0x2fd   : > { %v879_v63 = vpop.permute.xlu1 %878 }
 0x2fe   : > { %v887_v40 = vsel %vm773_vm5, %v886_v4, %v879_v63 }
 0x2ff   : > { %888 = vst.msk [vmem:[#allocation3 + $0x4] sm:$0xf] %vm775_vm6, %v887_v40 }
 0x306   : > { %v1642_v23 = vld [vmem:[#allocation3] sm:$0xff] }
 0x307   : > { %1670 = vmatpush.msra.mxu0 %v1642_v23 }
 0x308   : > { %1805 = vmatmul.msk.f32.vlgmr.msra.gmra.mxu0 %vm1647_vm8, %v1641_v42 }
 0x385   : > { %v1672_v39 = vpop.f32.mrf.mxu0 }
 0x386   : > { %v1675_v44 = vpack.c.bf16 %v1672_v39, %v1672_v39  ;;  %v1682_v59 = vmul.f32 %v1672_v39, %v1672_v39  ;;  %v1678_v26 = vsel %vm1677_vm9, %v1672_v39, 0.0 }
 0x387   : > { %1679 = vadd.xlane.f32.xlu2 %v1678_v26 }
 0x388   : > { %v1683_v2 = vsel %vm1677_vm9, %v1682_v59, 0.0  ;;  %1676 = vst.msk [vmem:[%s164_s29] sm:$0xf] %vm775_vm6, %v1675_v44 }
 0x389   : > { %1684 = vadd.xlane.f32.xlu0 %v1683_v2 }
 0x38a   : > { %1893 = shalt.err (!%p1890_p3)
}
 0x38b   : > { %1811 = dma.vmem_to_hbm [thread:$0]  (%p2001_p5), %s1708_s30, 64, %s1710_s4, %s1691_s16   ;;  %vm1688_vm10 = vcmask 15360  }
 0x38c   : > { %s1803_s17 = sshll.u32 %s2013_s24, 3 }
 0x38d   : > { %s179_s25 = scalar_lea.vmem %s2991_s3, %s1803_s17 }
 0x3fa   : > { %v1680_v38 = vpop.xlane.xlu2 %1679 }
 0x3fc   : > { %v1685_v29 = vpop.xlane.xlu0 %1684 }
 0x3fd   : > { %v1687_v62 = vsel %vm445_vm1, %v1680_v38, %v1685_v29 }
 0x3fe   : > { %1689 = vst.msk [vmem:[%s179_s25] sm:$0xff] %vm1688_vm10, %v1687_v62 }
 0x3ff PF: > { %p1817_p4 = scmp.ge.s32.totalorder %s1928_s15, 2  ;;  %s1724_s26 = sand.u32 1, %s1916_s12  }
 0x400   : > { %s1725_s22 = scalar_lea.sflag [#allocation5], %s1724_s26 }
 0x401   : > { %p1814_p7 = pnand %p1817_p4, %p2005_p6 }
 0x403   : > { %p1815_p5 = pneg %p1814_p7 }
 0x405   : > { %1911 = dma.done.wait (%p1815_p5), %s1725_s22, 64  }
 0x406   : > { %1913 = vsyncadd (%p1815_p5), %s1725_s22, 4294967232  ;;  %p14_p8 = scmp.ge.s32.totalorder %s1988_s18, 4   ;;  %s2994_s12 = smov %s1920_s13 }
 0x407   : > { %s2995_s13 = smov %s1924_s14  ;;  %s2996_s14 = smov %s1999_s21 }
 0x408   : > { %s2997_s15 = smov %s1988_s18  ;;  %16 = sbr.rel (!%p14_p8) target bundleno = 3 (0x3), region = 75 }
 0x40d   :  { %1738 = vsyncpa [#allocation5], 1 }
 0x40e   :  { %1740 = vsyncpa [#allocation5 + $0x1], 1 }

</bundles_post_ra>
